<compile_context>
chip_gen: v7x
topology: tpu7x:2x2x1
jax: 0.10.0
libtpu: 0.0.40
codegen_flags: <defaults>
</compile_context>

<pallas_src>
import jax
import jax.numpy as jnp
from jax.experimental import pallas as pl
from jax.experimental.pallas import tpu as pltpu

_LANE = 128
_SUBLANE = 8


def _round_up(x, m):
    return (x + m - 1) // m * m


def _pad_to(a, shape):
    return jnp.pad(a, [(0, t - s) for s, t in zip(a.shape, shape)])


def _vmem_limit_bytes():
    """Per-generation scoped-VMEM budget: ~48 MiB on 64-MiB parts (v7x),
    ~100 MiB on 128-MiB parts (v5e/v6e)."""
    cap = 64 * 1024 * 1024
    try:
        cap = int(getattr(pltpu.get_tpu_info(), "vmem_capacity_bytes", cap))
    except Exception:  # interpret mode / older runtimes
        pass
    return max(32 * 1024 * 1024, min(cap - 16 * 1024 * 1024, 100 * 1024 * 1024))


# ----------------------------------------------------------------------------
# Pallas kernel 1: fused BN(eval) + ReLU + 1x1 conv  ==  relu(x*s + b) @ W
# ----------------------------------------------------------------------------
def _make_bn_relu_conv1x1_kernel(cin, use_mxu):
    def kernel(x_ref, scale_ref, shift_ref, w_ref, o_ref):
        x = x_ref[...].astype(jnp.float32)
        act = jnp.maximum(x * scale_ref[...] + shift_ref[...], 0.0)
        if use_mxu:
            out = jnp.dot(act.astype(jnp.bfloat16),
                          w_ref[...].astype(jnp.bfloat16),
                          preferred_element_type=jnp.float32)
        else:
            # Tiny input-channel count: do the 1x1 conv as C outer-product FMAs
            # on the VPU (avoids a K=C MXU matmul and any channel zero-padding).
            w = w_ref[...]
            out = act[:, 0:1] * w[0:1, :]
            for c in range(1, cin):
                out = out + act[:, c:c + 1] * w[c:c + 1, :]
        o_ref[...] = out.astype(o_ref.dtype)
    return kernel


def bn_relu_conv1x1(x_flat, scale, shift, w, *, vmem_limit, tm=2048,
                    out_dtype=jnp.bfloat16):
    """x_flat: (M, Cin) bf16/f32 (unpadded); scale/shift: (Cin,) f32;
    w: (Cin, Cout) f32 with Cout lane-aligned.  Returns (M, Cout) out_dtype."""
    M, Cin = x_flat.shape
    Cout = w.shape[1]
    in_b = jnp.dtype(x_flat.dtype).itemsize
    out_b = jnp.dtype(out_dtype).itemsize

    # Memory-bound kernel: pick the largest row tile that keeps the
    # double-buffered in/out tiles + weights well inside the VMEM budget.
    tm = min(tm, M)
    while tm > 256 and (2 * tm * Cin * in_b + 2 * tm * Cout * out_b
                        + Cin * Cout * 4) > vmem_limit // 2:
        tm //= 2
    tm = max(_SUBLANE, (tm // _SUBLANE) * _SUBLANE)
    grid_m = pl.cdiv(M, tm)   # ragged last tile -> masked OOB stores

    kernel = _make_bn_relu_conv1x1_kernel(Cin, use_mxu=Cin > 16)
    return pl.pallas_call(
        kernel,
        out_shape=jax.ShapeDtypeStruct((M, Cout), out_dtype),
        grid_spec=pltpu.PrefetchScalarGridSpec(
            num_scalar_prefetch=0,
            grid=(grid_m,),
            in_specs=[
                pl.BlockSpec((tm, Cin), lambda i: (i, 0)),
                pl.BlockSpec((1, Cin), lambda i: (0, 0)),
                pl.BlockSpec((1, Cin), lambda i: (0, 0)),
                pl.BlockSpec((Cin, Cout), lambda i: (0, 0)),
            ],
            out_specs=pl.BlockSpec((tm, Cout), lambda i: (i, 0)),
        ),
        compiler_params=pltpu.CompilerParams(
            dimension_semantics=("parallel",),
            vmem_limit_bytes=vmem_limit),
    )(x_flat, scale.reshape(1, Cin), shift.reshape(1, Cin), w)


# ----------------------------------------------------------------------------
# Pallas kernel 2: all pyramid levels + spp_fuse, fused.
# grid = (N, L); per step (n, l):
#   at l==0:  acc        = relu(x_bn * sf0 + bf0) @ Wf0       (fuse K-chunk 0)
#             pooled_all = pool_all @ x_bn                     (hoisted, ALL levels)
#   pooled = pooled_all[l*G_slot : (l+1)*G_slot]               (G_slot, bt_pad)
#   y      = relu(pooled * s_l + b_l) @ W_l                    (G_slot, Cl_pad)
#   up     = up_l @ y                                          (HW,     Cl_pad)
#   acc   += relu(up * sf_l + bf_l) @ Wf_l                     (fuse K-chunk l+1)
#   at l==L-1:  o = acc.astype(bf16)    (single bf16 writeback)
# ----------------------------------------------------------------------------
def _make_spp_fused_kernel(g_slot):
    def kernel(x_ref, pool_all_ref, up_ref, s_lvl_ref, b_lvl_ref, w_lvl_ref,
               sf0_ref, bf0_ref, wf0_ref, sf_lvl_ref, bf_lvl_ref, wf_lvl_ref,
               o_ref, pooled_scr, acc_scr):
        l = pl.program_id(1)
        x_bf = x_ref[0]                                      # (HW, bt_pad) bf16

        @pl.when(l == 0)
        def _init():
            # fuse K-chunk 0 (the x_bn channels) initializes the accumulator.
            act0 = jnp.maximum(
                x_bf.astype(jnp.float32) * sf0_ref[...] + bf0_ref[...], 0.0)
            acc_scr[...] = jnp.dot(act0.astype(jnp.bfloat16), wf0_ref[...],
                                   preferred_element_type=jnp.float32)
            # ALL levels' adaptive-average pools in ONE hoisted matmul.
            pooled_scr[...] = jnp.dot(pool_all_ref[...], x_bf,
                                      preferred_element_type=jnp.float32)

        g0 = pl.multiple_of(l * g_slot, g_slot)
        pooled = pooled_scr[pl.ds(g0, g_slot), :]            # (g_slot, bt_pad)
        act = jnp.maximum(pooled * s_lvl_ref[0] + b_lvl_ref[0], 0.0)
        y = jnp.dot(act.astype(jnp.bfloat16), w_lvl_ref[0],
                    preferred_element_type=jnp.float32)      # (g_slot, Cl_pad)
        up = jnp.dot(up_ref[0], y.astype(jnp.bfloat16),
                     preferred_element_type=jnp.float32)     # (HW, Cl_pad)
        actf = jnp.maximum(up * sf_lvl_ref[0] + bf_lvl_ref[0], 0.0)
        acc_scr[...] += jnp.dot(actf.astype(jnp.bfloat16), wf_lvl_ref[0],
                                preferred_element_type=jnp.float32)

        @pl.when(l == pl.num_programs(1) - 1)
        def _store():
            o_ref[0] = acc_scr[...].astype(o_ref.dtype)
    return kernel


# ----------------------------------------------------------------------------
# Glue: pooling / upsampling matrices + parameter folding (plain JAX).
# ----------------------------------------------------------------------------
def adaptive_pool_matrix(in_size, out_size):
    """1-D adaptive average pooling as a (out_size, in_size) matrix (PyTorch bins)."""
    rows = []
    for i in range(out_size):
        start = (i * in_size) // out_size
        end = -((-(i + 1) * in_size) // out_size)
        row = jnp.zeros((in_size,), jnp.float32).at[start:end].set(
            1.0 / float(end - start))
        rows.append(row)
    return jnp.stack(rows, axis=0)


def bilinear_upsample_matrix(out_size, in_size):
    """1-D bilinear interpolation (align_corners=True) as (out_size, in_size)."""
    rows = []
    for h in range(out_size):
        row = [0.0] * in_size
        src = 0.0 if (in_size == 1 or out_size == 1) else h * (in_size - 1) / (out_size - 1)
        i0 = min(int(src), in_size - 1)
        i1 = min(i0 + 1, in_size - 1)
        frac = src - i0
        row[i0] += 1.0 - frac
        row[i1] += frac
        rows.append(row)
    return jnp.asarray(rows, jnp.float32)


def init_bnreluconv_params(key, cin, cout):
    """Synthetic params for _BNReluConv(k=1, bias=False), BN folded (eval mode)."""
    k1, k2, k3, k4, k5 = jax.random.split(key, 5)
    gamma = 1.0 + 0.1 * jax.random.normal(k1, (cin,), jnp.float32)
    beta = 0.1 * jax.random.normal(k2, (cin,), jnp.float32)
    running_mean = 0.1 * jax.random.normal(k3, (cin,), jnp.float32)
    running_var = 0.5 + jnp.abs(jax.random.normal(k4, (cin,), jnp.float32))
    w_pt = jax.random.normal(k5, (cout, cin, 1, 1), jnp.float32) / jnp.sqrt(float(cin))
    eps = 1e-5
    scale = gamma / jnp.sqrt(running_var + eps)
    shift = beta - running_mean * scale
    w_mat = jnp.transpose(w_pt[:, :, 0, 0], (1, 0))   # (cin, cout)
    return scale, shift, w_mat


def spatial_pyramid_pooling(x_nchw, params, grids, num_levels, square_grid=False):
    N, C, H, W = x_nchw.shape
    HW = H * W
    ar = W / H
    L = num_levels
    vmem_limit = _vmem_limit_bytes()

    s_bn, b_bn, w_bn = params["spp_bn"]
    bt = w_bn.shape[1]
    s_f, b_f, w_f = params["spp_fuse"]
    out_ch = w_f.shape[1]
    Cl = params["spp0"][2].shape[1]

    bt_pad = _round_up(bt, _LANE)
    Cl_pad = _round_up(Cl, _LANE)
    out_pad = _round_up(out_ch, _LANE)

    # ---- stage 1: spp_bn over all N*H*W pixels ------------------------------
    # One fused XLA pass: NCHW -> (M, C) channels-last + bf16 cast.  No HBM
    # zero-padding of the activation in either M or C (only tiny params pad).
    x_flat = jnp.transpose(x_nchw, (0, 2, 3, 1)).reshape(N * HW, C)
    x_flat = x_flat.astype(jnp.bfloat16)
    x_bn = bn_relu_conv1x1(x_flat, s_bn, b_bn, _pad_to(w_bn, (C, bt_pad)),
                           vmem_limit=vmem_limit)
    x_bn = x_bn.reshape(N, HW, bt_pad)             # bf16; padded channels are 0

    # ---- pooling / upsampling matrices (dense Kronecker, 128-row slots) -----
    sizes = []
    for i in range(L):
        if square_grid:
            gh = gw = int(grids[i])
        else:
            gh = int(grids[i])
            gw = max(1, round(ar * grids[i]))
        sizes.append((gh, gw))
    # Fixed 128-row slot per level: lane-dense upsample matrices, clean K=128
    # upsample contraction, and a uniform slice stride inside the kernel.
    G_slot = _round_up(max(gh * gw for gh, gw in sizes), _LANE)

    pool_rows, up_mats = [], []
    for gh, gw in sizes:
        pool = jnp.kron(adaptive_pool_matrix(H, gh), adaptive_pool_matrix(W, gw))
        up = jnp.kron(bilinear_upsample_matrix(H, gh), bilinear_upsample_matrix(W, gw))
        pool_rows.append(_pad_to(pool, (G_slot, HW)))   # zero rows for padded G
        up_mats.append(_pad_to(up, (HW, G_slot)))       # zero cols for padded G
    pool_all = jnp.concatenate(pool_rows, axis=0).astype(jnp.bfloat16)  # (L*G_slot, HW)
    up_stk = jnp.stack(up_mats).astype(jnp.bfloat16)                    # (L, HW, G_slot)

    # ---- per-level conv params + K-split of the fuse conv -------------------
    s_lvl = jnp.stack([_pad_to(params[f"spp{i}"][0], (bt_pad,)) for i in range(L)]).reshape(L, 1, bt_pad)
    b_lvl = jnp.stack([_pad_to(params[f"spp{i}"][1], (bt_pad,)) for i in range(L)]).reshape(L, 1, bt_pad)
    w_lvl = jnp.stack([_pad_to(params[f"spp{i}"][2], (bt_pad, Cl_pad)) for i in range(L)]).astype(jnp.bfloat16)

    sf0 = _pad_to(s_f[:bt], (bt_pad,)).reshape(1, bt_pad)
    bf0 = _pad_to(b_f[:bt], (bt_pad,)).reshape(1, bt_pad)
    wf0 = _pad_to(w_f[:bt], (bt_pad, out_pad)).astype(jnp.bfloat16)
    sf_lvl = jnp.stack([_pad_to(s_f[bt + i * Cl: bt + (i + 1) * Cl], (Cl_pad,)) for i in range(L)]).reshape(L, 1, Cl_pad)
    bf_lvl = jnp.stack([_pad_to(b_f[bt + i * Cl: bt + (i + 1) * Cl], (Cl_pad,)) for i in range(L)]).reshape(L, 1, Cl_pad)
    wf_lvl = jnp.stack([_pad_to(w_f[bt + i * Cl: bt + (i + 1) * Cl], (Cl_pad, out_pad)) for i in range(L)]).astype(jnp.bfloat16)

    # ---- whole-HW blocks: check the per-step VMEM budget (v7x has 64 MiB) ---
    per_step_bytes = (
        2 * HW * bt_pad * 2            # x_bn block (bf16, double-buffered)
        + 2 * L * G_slot * HW * 2      # pool_all  (bf16, double-buffered)
        + 2 * HW * G_slot * 2          # up block  (bf16, double-buffered)
        + 2 * HW * out_pad * 2         # output block (bf16, double-buffered)
        + HW * out_pad * 4             # f32 fuse accumulator scratch
        + L * G_slot * bt_pad * 4      # f32 pooled scratch
        + 2 * (bt_pad * Cl_pad + bt_pad * out_pad + Cl_pad * out_pad) * 2)
    if per_step_bytes > vmem_limit:
        # TODO(synk): switch to an HW-tiled kernel-2 grid for very large maps.
        raise ValueError(
            f"SPP kernel-2 working set {per_step_bytes / 2**20:.1f} MiB exceeds "
            f"the scoped VMEM budget {vmem_limit / 2**20:.1f} MiB; tile HW.")

    # ---- stage 2: fused pyramid levels + spp_fuse ----------------------------
    out = pl.pallas_call(
        _make_spp_fused_kernel(G_slot),
        out_shape=jax.ShapeDtypeStruct((N, HW, out_pad), jnp.bfloat16),
        grid_spec=pltpu.PrefetchScalarGridSpec(
            num_scalar_prefetch=0,
            grid=(N, L),
            in_specs=[
                pl.BlockSpec((1, HW, bt_pad), lambda n, l: (n, 0, 0)),       # x_bn (resident over l)
                pl.BlockSpec((L * G_slot, HW), lambda n, l: (0, 0)),         # pool_all (resident)
                pl.BlockSpec((1, HW, G_slot), lambda n, l: (l, 0, 0)),       # up_l
                pl.BlockSpec((1, 1, bt_pad), lambda n, l: (l, 0, 0)),        # s_lvl
                pl.BlockSpec((1, 1, bt_pad), lambda n, l: (l, 0, 0)),        # b_lvl
                pl.BlockSpec((1, bt_pad, Cl_pad), lambda n, l: (l, 0, 0)),   # w_lvl
                pl.BlockSpec((1, bt_pad), lambda n, l: (0, 0)),              # sf0
                pl.BlockSpec((1, bt_pad), lambda n, l: (0, 0)),              # bf0
                pl.BlockSpec((bt_pad, out_pad), lambda n, l: (0, 0)),        # wf0
                pl.BlockSpec((1, 1, Cl_pad), lambda n, l: (l, 0, 0)),        # sf_lvl
                pl.BlockSpec((1, 1, Cl_pad), lambda n, l: (l, 0, 0)),        # bf_lvl
                pl.BlockSpec((1, Cl_pad, out_pad), lambda n, l: (l, 0, 0)),  # wf_lvl
            ],
            out_specs=pl.BlockSpec((1, HW, out_pad), lambda n, l: (n, 0, 0)),
            scratch_shapes=[
                pltpu.VMEM((L * G_slot, bt_pad), jnp.float32),   # pooled_all
                pltpu.VMEM((HW, out_pad), jnp.float32),          # fuse accumulator
            ],
        ),
        compiler_params=pltpu.CompilerParams(
            dimension_semantics=("parallel", "arbitrary"),
            vmem_limit_bytes=vmem_limit),
    )(x_bn, pool_all, up_stk, s_lvl, b_lvl, w_lvl,
      sf0, bf0, wf0, sf_lvl, bf_lvl, wf_lvl)

    out = out[:, :, :out_ch].astype(x_nchw.dtype).reshape(N, H, W, out_ch)
    # TODO(synk): skip this NHWC->NCHW pass if the consumer takes channels-last.
    return jnp.transpose(out, (0, 3, 1, 2))


# ----------------------------------------------------------------------------
# Pure-JAX f32 reference (same folded params / pooling & upsample semantics).
# ----------------------------------------------------------------------------
def reference(x_nchw, params, grids, num_levels, square_grid=False):
    N, C, H, W = x_nchw.shape
    ar = W / H
    hp = jax.lax.Precision.HIGHEST

    def brc(t, p):
        s, b, w = p
        a = jnp.maximum(t * s + b, 0.0)
        return jnp.einsum('nhwc,cd->nhwd', a, w, precision=hp)

    x = jnp.transpose(x_nchw, (0, 2, 3, 1))
    xb = brc(x, params["spp_bn"])
    levels = [xb]
    for i in range(num_levels):
        if square_grid:
            gh = gw = int(grids[i])
        else:
            gh = int(grids[i])
            gw = max(1, round(ar * grids[i]))
        Ph = adaptive_pool_matrix(H, gh)
        Pw = adaptive_pool_matrix(W, gw)
        pooled = jnp.einsum('ih,jw,nhwc->nijc', Ph, Pw, xb, precision=hp)
        y = brc(pooled, params[f"spp{i}"])
        Ah = bilinear_upsample_matrix(H, gh)
        Aw = bilinear_upsample_matrix(W, gw)
        up = jnp.einsum('hi,wj,nijc->nhwc', Ah, Aw, y, precision=hp)
        levels.append(up)
    cat = jnp.concatenate(levels, axis=-1)
    out = brc(cat, params["spp_fuse"])
    return jnp.transpose(out, (0, 3, 1, 2))


if __name__ == "__main__":
    N, Cin, H, W = 2, 4, 16, 16
    bt_size, level_size, out_size = 64, 32, 32
    num_levels = 3
    grids = (6, 3, 2, 1)

    key = jax.random.PRNGKey(0)
    kx, k_bn, k0, k1, k2, k_fuse = jax.random.split(key, 6)
    x = jax.random.normal(kx, (N, Cin, H, W), jnp.float32)

    params = {
        "spp_bn": init_bnreluconv_params(k_bn, Cin, bt_size),
        "spp0": init_bnreluconv_params(k0, bt_size, level_size),
        "spp1": init_bnreluconv_params(k1, bt_size, level_size),
        "spp2": init_bnreluconv_params(k2, bt_size, level_size),
        "spp_fuse": init_bnreluconv_params(
            k_fuse, bt_size + num_levels * level_size, out_size),
    }

    out = spatial_pyramid_pooling(x, params, grids, num_levels)
    out = jax.block_until_ready(out)

    ref = reference(x, params, grids, num_levels)
    assert out.shape == (N, out_size, H, W), out.shape
    max_err = float(jnp.max(jnp.abs(out - ref)))
    # bf16 input / MXU operands / final writeback (f32 accumulation) vs f32 ref.
    assert jnp.allclose(out, ref, rtol=5e-2, atol=5e-2), max_err
    print("KERNEL_OK")
</pallas_src>

<mosaic_0001>
module attributes {stable_mosaic.version = 11 : i64} {
  func.func @kernel(%arg0: i32, %arg1: memref<512x4xbf16, #tpu.memory_space<vmem>>, %arg2: memref<1x4xf32, #tpu.memory_space<vmem>>, %arg3: memref<1x4xf32, #tpu.memory_space<vmem>>, %arg4: memref<4x128xf32, #tpu.memory_space<vmem>>, %arg5: memref<512x128xbf16, #tpu.memory_space<vmem>>) attributes {dimension_semantics = [#tpu.dimension_semantics<parallel>], iteration_bounds = array<i64: 1>, scalar_prefetch = 0 : i64, scratch_operands = 0 : i64, tpu.core_type = #tpu.core_type<tc>, window_params = [{transform_indices = @transform_0, window_bounds = array<i64: 512, 4>}, {pipeline_mode = #tpu.pipeline_mode<synchronous>, transform_indices = @transform_1, window_bounds = array<i64: 1, 4>}, {pipeline_mode = #tpu.pipeline_mode<synchronous>, transform_indices = @transform_2, window_bounds = array<i64: 1, 4>}, {pipeline_mode = #tpu.pipeline_mode<synchronous>, transform_indices = @transform_3, window_bounds = array<i64: 4, 128>}, {transform_indices = @transform_4, window_bounds = array<i64: 512, 128>}]} {
    %c0 = arith.constant 0 : index
    %c0_0 = arith.constant 0 : index
    %0 = vector.load %arg1[%c0, %c0_0] : memref<512x4xbf16, #tpu.memory_space<vmem>>, vector<512x4xbf16>
    %1 = arith.extf %0 : vector<512x4xbf16> to vector<512x4xf32>
    %c0_1 = arith.constant 0 : index
    %c0_2 = arith.constant 0 : index
    %2 = vector.load %arg2[%c0_1, %c0_2] : memref<1x4xf32, #tpu.memory_space<vmem>>, vector<1x4xf32>
    %3 = vector.broadcast %2 : vector<1x4xf32> to vector<512x4xf32>
    %4 = arith.mulf %1, %3 : vector<512x4xf32>
    %c0_3 = arith.constant 0 : index
    %c0_4 = arith.constant 0 : index
    %5 = vector.load %arg3[%c0_3, %c0_4] : memref<1x4xf32, #tpu.memory_space<vmem>>, vector<1x4xf32>
    %6 = vector.broadcast %5 : vector<1x4xf32> to vector<512x4xf32>
    %7 = arith.addf %4, %6 : vector<512x4xf32>
    %cst = arith.constant 0.000000e+00 : f32
    %8 = vector.broadcast %cst : f32 to vector<512x4xf32>
    %9 = arith.maximumf %7, %8 : vector<512x4xf32>
    %c0_5 = arith.constant 0 : index
    %c0_6 = arith.constant 0 : index
    %10 = vector.load %arg4[%c0_5, %c0_6] : memref<4x128xf32, #tpu.memory_space<vmem>>, vector<4x128xf32>
    %11 = vector.extract_strided_slice %9 {offsets = [0, 0], sizes = [512, 1], strides = [1, 1]} : vector<512x4xf32> to vector<512x1xf32>
    %12 = vector.extract_strided_slice %10 {offsets = [0, 0], sizes = [1, 128], strides = [1, 1]} : vector<4x128xf32> to vector<1x128xf32>
    %13 = vector.broadcast %11 : vector<512x1xf32> to vector<512x128xf32>
    %14 = vector.broadcast %12 : vector<1x128xf32> to vector<512x128xf32>
    %15 = arith.mulf %13, %14 : vector<512x128xf32>
    %16 = vector.extract_strided_slice %9 {offsets = [0, 1], sizes = [512, 1], strides = [1, 1]} : vector<512x4xf32> to vector<512x1xf32>
    %17 = vector.extract_strided_slice %10 {offsets = [1, 0], sizes = [1, 128], strides = [1, 1]} : vector<4x128xf32> to vector<1x128xf32>
    %18 = vector.broadcast %16 : vector<512x1xf32> to vector<512x128xf32>
    %19 = vector.broadcast %17 : vector<1x128xf32> to vector<512x128xf32>
    %20 = arith.mulf %18, %19 : vector<512x128xf32>
    %21 = arith.addf %15, %20 : vector<512x128xf32>
    %22 = vector.extract_strided_slice %9 {offsets = [0, 2], sizes = [512, 1], strides = [1, 1]} : vector<512x4xf32> to vector<512x1xf32>
    %23 = vector.extract_strided_slice %10 {offsets = [2, 0], sizes = [1, 128], strides = [1, 1]} : vector<4x128xf32> to vector<1x128xf32>
    %24 = vector.broadcast %22 : vector<512x1xf32> to vector<512x128xf32>
    %25 = vector.broadcast %23 : vector<1x128xf32> to vector<512x128xf32>
    %26 = arith.mulf %24, %25 : vector<512x128xf32>
    %27 = arith.addf %21, %26 : vector<512x128xf32>
    %28 = vector.extract_strided_slice %9 {offsets = [0, 3], sizes = [512, 1], strides = [1, 1]} : vector<512x4xf32> to vector<512x1xf32>
    %29 = vector.extract_strided_slice %10 {offsets = [3, 0], sizes = [1, 128], strides = [1, 1]} : vector<4x128xf32> to vector<1x128xf32>
    %30 = vector.broadcast %28 : vector<512x1xf32> to vector<512x128xf32>
    %31 = vector.broadcast %29 : vector<1x128xf32> to vector<512x128xf32>
    %32 = arith.mulf %30, %31 : vector<512x128xf32>
    %33 = arith.addf %27, %32 : vector<512x128xf32>
    %34 = arith.truncf %33 : vector<512x128xf32> to vector<512x128xbf16>
    %c0_7 = arith.constant 0 : index
    %c0_8 = arith.constant 0 : index
    %35 = vector.load %arg5[%c0_7, %c0_8] : memref<512x128xbf16, #tpu.memory_space<vmem>>, vector<512x128xbf16>
    tpu.vector_store %arg5[%c0_7, %c0_8], %34 {strides = array<i32>} : memref<512x128xbf16, #tpu.memory_space<vmem>>, vector<512x128xbf16>,
    return
  }
  func.func @transform_0(%arg0: i32) -> (i32, i32) {
    %c0_i32 = arith.constant 0 : i32
    %c0_i32_0 = arith.constant 0 : i32
    return %arg0, %c0_i32 : i32, i32
  }
  func.func @transform_1(%arg0: i32) -> (i32, i32) {
    %c0_i32 = arith.constant 0 : i32
    %c0_i32_0 = arith.constant 0 : i32
    %c0_i32_1 = arith.constant 0 : i32
    return %c0_i32, %c0_i32_0 : i32, i32
  }
  func.func @transform_2(%arg0: i32) -> (i32, i32) {
    %c0_i32 = arith.constant 0 : i32
    %c0_i32_0 = arith.constant 0 : i32
    %c0_i32_1 = arith.constant 0 : i32
    return %c0_i32, %c0_i32_0 : i32, i32
  }
  func.func @transform_3(%arg0: i32) -> (i32, i32) {
    %c0_i32 = arith.constant 0 : i32
    %c0_i32_0 = arith.constant 0 : i32
    %c0_i32_1 = arith.constant 0 : i32
    return %c0_i32, %c0_i32_0 : i32, i32
  }
  func.func @transform_4(%arg0: i32) -> (i32, i32) {
    %c0_i32 = arith.constant 0 : i32
    %c0_i32_0 = arith.constant 0 : i32
    return %arg0, %c0_i32 : i32, i32
  }
}

</mosaic_0001>

<bundles_post_ra>
// kernel: tpu_custom_call.1
= control target key start
LH: loop header
LB: loop body
LE: loop exit
PB: predicated region body
PF: predicated region fallthrough
CT: control target
= control target key end

     0   :  { %v2760_v2 = vmov 0   ;;  %s4358_s0 = inlined_call_operand.vmem [shape: bf16[512,4], index: 0, kind: input, shape index: {}]   ;;  %s4359_s1 = inlined_call_operand.vmem [shape: f32[1,4], index: 1, kind: input, shape index: {}]   ;;  %s4360_s2 = inlined_call_operand.vmem [shape: f32[1,4], index: 2, kind: input, shape index: {}]   ;;  %s4361_s3 = inlined_call_operand.vmem [shape: f32[4,128], index: 3, kind: input, shape index: {}]   ;;  %s4362_s4 = inlined_call_operand.hbm [shape: bf16[512,128], index: 4, kind: output, shape index: {}]  }
   0x1   :  { %v2659_v0 = vld [vmem:[%s4358_s0 + $0x8] sm:$0xff]   ;;  %v2798_v1 = vld [vmem:[%s4359_s1] ss:$0 sm:$0xff]  ;;  %2729 = vset.pattern.permute.xlu1 %v2760_v2  ;;  %2728 = vset.pattern.permute.xlu0 %v2760_v2  ;;  %v2660_v6 = vld [vmem:[%s4358_s0 + $0x10] sm:$0xff]  }
   0x2   :  { %v2377_v3 = vunpack.c.l.bf16 %v2659_v0  ;;  %v2372_v4 = vld [vmem:[%s4358_s0] sm:$0xff]   ;;  %v2378_v5 = vunpack.c.h.bf16 %v2659_v0  ;;  %v2661_v7 = vld [vmem:[%s4358_s0 + $0x18] sm:$0xff]   ;;  %v2382_v11 = vunpack.c.h.bf16 %v2660_v6  ;;  %v2381_v12 = vunpack.c.l.bf16 %v2660_v6  ;;  %v2663_v36 = vld [vmem:[%s4358_s0 + $0x28] sm:$0xff]  }
   0x3   :  { %v2812_v8 = vld [vmem:[%s4360_s2] ss:$0 sm:$0xff]  ;;  %v2373_v9 = vunpack.c.l.bf16 %v2372_v4  ;;  %v2374_v10 = vunpack.c.h.bf16 %v2372_v4  ;;  %v2386_v15 = vunpack.c.h.bf16 %v2661_v7  ;;  %v2385_v16 = vunpack.c.l.bf16 %v2661_v7 }
   0x4   :  { %v155_v13 = vmul.f32 %v2377_v3, %v2798_v1  ;;  %v156_v14 = vmul.f32 %v2378_v5, %v2798_v1  ;;  %v158_v19 = vmul.f32 %v2382_v11, %v2798_v1  ;;  %v157_v24 = vmul.f32 %v2381_v12, %v2798_v1  ;;  %v2662_v25 = vld [vmem:[%s4358_s0 + $0x20] sm:$0xff]  }
   0x5   :  { %v153_v17 = vmul.f32 %v2373_v9, %v2798_v1  ;;  %v154_v18 = vmul.f32 %v2374_v10, %v2798_v1  ;;  %v160_v27 = vmul.f32 %v2386_v15, %v2798_v1  ;;  %v159_v28 = vmul.f32 %v2385_v16, %v2798_v1 }
   0x6   :  { %v226_v20 = vadd.f32 %v2812_v8, %v155_v13  ;;  %v227_v21 = vadd.f32 %v2812_v8, %v156_v14  ;;  %v229_v30 = vadd.f32 %v2812_v8, %v158_v19  ;;  %v2390_v32 = vunpack.c.h.bf16 %v2662_v25 }
   0x7   :  { %v224_v22 = vadd.f32 %v2812_v8, %v153_v17  ;;  %v225_v23 = vadd.f32 %v2812_v8, %v154_v18  ;;  %v2389_v33 = vunpack.c.l.bf16 %v2662_v25  ;;  %v228_v35 = vadd.f32 %v2812_v8, %v157_v24 }
   0x8   :  { %v2827_v26 = vmax.f32 %v226_v20, 0.0  ;;  %v2835_v31 = vmax.f32 %v227_v21, 0.0  ;;  %v231_v37 = vadd.f32 %v2812_v8, %v160_v27  ;;  %v230_v38 = vadd.f32 %v2812_v8, %v159_v28 }
   0x9   :  { %v2831_v29 = vmax.f32 %v224_v22, 0.0  ;;  %v2838_v34 = vmax.f32 %v225_v23, 0.0  ;;  %v2846_v39 = vmax.f32 %v229_v30, 0.0 }
   0xa   :  { %365 = vperm.xlu1 %2729, %v2827_v26  }
   0xb   :  { %355 = vperm.xlu0 %2728, %v2831_v29  }
   0xc   :  { %9 = vsyncpa [#allocation3], 0  ;;  %v162_v40 = vmul.f32 %v2390_v32, %v2798_v1  ;;  %v161_v41 = vmul.f32 %v2389_v33, %v2798_v1  ;;  %v2394_v42 = vunpack.c.h.bf16 %v2663_v36  ;;  %v2393_v43 = vunpack.c.l.bf16 %v2663_v36  ;;  %v2664_v44 = vld [vmem:[%s4358_s0 + $0x30] sm:$0xff]   ;;  %v2665_v45 = vld [vmem:[%s4358_s0 + $0x38] sm:$0xff]  }
   0xd   :  { %v2858_v46 = vmax.f32 %v228_v35, 0.0  ;;  %v2860_v47 = vmax.f32 %v231_v37, 0.0  ;;  %v2862_v48 = vmax.f32 %v230_v38, 0.0  ;;  %v2666_v49 = vld [vmem:[%s4358_s0 + $0x40] sm:$0xff]   ;;  %v2667_v50 = vld [vmem:[%s4358_s0 + $0x48] sm:$0xff]   ;;  %v2398_v51 = vunpack.c.h.bf16 %v2664_v44  ;;  %v2668_v55 = vld [vmem:[%s4358_s0 + $0x50] sm:$0xff]  }
   0xe   :  { %370 = vperm.xlu1 %2729, %v2835_v31   ;;  %v2397_v52 = vunpack.c.l.bf16 %v2664_v44  ;;  %v2402_v53 = vunpack.c.h.bf16 %v2665_v45  ;;  %v2401_v54 = vunpack.c.l.bf16 %v2665_v45  ;;  %v2669_v56 = vld [vmem:[%s4358_s0 + $0x58] sm:$0xff]   ;;  %v233_v57 = vadd.f32 %v2812_v8, %v162_v40  ;;  %v2670_v37 = vld [vmem:[%s4358_s0 + $0x60] sm:$0xff]  }
   0xf   :  { %360 = vperm.xlu0 %2728, %v2838_v34   ;;  %v232_v58 = vadd.f32 %v2812_v8, %v161_v41  ;;  %v164_v59 = vmul.f32 %v2394_v42, %v2798_v1  ;;  %v163_v60 = vmul.f32 %v2393_v43, %v2798_v1  ;;  %v2406_v61 = vunpack.c.h.bf16 %v2666_v49 }
  0x10   :  { %v2405_v62 = vunpack.c.l.bf16 %v2666_v49  ;;  %v2410_v63 = vunpack.c.h.bf16 %v2667_v50  ;;  %v2409_v0 = vunpack.c.l.bf16 %v2667_v50  ;;  %v2414_v2 = vunpack.c.h.bf16 %v2668_v55 }
  0x11   :  { %v2413_v3 = vunpack.c.l.bf16 %v2668_v55  ;;  %v2418_v4 = vunpack.c.h.bf16 %v2669_v56  ;;  %v2417_v5 = vunpack.c.l.bf16 %v2669_v56  ;;  %v166_v6 = vmul.f32 %v2398_v51, %v2798_v1 }
  0x12   :  { %380 = vperm.xlu1 %2729, %v2846_v39   ;;  %v165_v7 = vmul.f32 %v2397_v52, %v2798_v1  ;;  %v168_v9 = vmul.f32 %v2402_v53, %v2798_v1  ;;  %v167_v10 = vmul.f32 %v2401_v54, %v2798_v1  ;;  %v2887_v11 = vmax.f32 %v233_v57, 0.0  ;;  %v2671_v52 = vld [vmem:[%s4358_s0 + $0x68] sm:$0xff]   ;;  %v2672_v53 = vld [vmem:[%s4358_s0 + $0x70] sm:$0xff]  }
  0x13   :  { %375 = vperm.xlu0 %2728, %v2858_v46   ;;  %v2889_v12 = vmax.f32 %v232_v58, 0.0  ;;  %v235_v13 = vadd.f32 %v2812_v8, %v164_v59  ;;  %v234_v14 = vadd.f32 %v2812_v8, %v163_v60  ;;  %v170_v15 = vmul.f32 %v2406_v61, %v2798_v1  ;;  %v2674_v58 = vld [vmem:[%s4358_s0 + $0x80] sm:$0xff]  }
  0x14   :  { %v169_v16 = vmul.f32 %v2405_v62, %v2798_v1  ;;  %v172_v17 = vmul.f32 %v2410_v63, %v2798_v1  ;;  %v171_v18 = vmul.f32 %v2409_v0, %v2798_v1  ;;  %v174_v19 = vmul.f32 %v2414_v2, %v2798_v1  ;;  %v2675_v63 = vld [vmem:[%s4358_s0 + $0x88] sm:$0xff]   ;;  %v2676_v0 = vld [vmem:[%s4358_s0 + $0x90] sm:$0xff]  }
  0x15   :  { %4395 = vst [vmem:[#allocation5_spill] sm:$0xff] %v2889_v12  ;;  %v173_v20 = vmul.f32 %v2413_v3, %v2798_v1  ;;  %v176_v21 = vmul.f32 %v2418_v4, %v2798_v1  ;;  %v175_v22 = vmul.f32 %v2417_v5, %v2798_v1  ;;  %v237_v23 = vadd.f32 %v2812_v8, %v166_v6  ;;  %v2677_v6 = vld [vmem:[%s4358_s0 + $0x98] sm:$0xff]  }
  0x16   :  { %390 = vperm.xlu1 %2729, %v2860_v47   ;;  %v236_v24 = vadd.f32 %v2812_v8, %v165_v7  ;;  %v2905_v25 = vmax.f32 %v235_v13, 0.0  ;;  %v2907_v27 = vmax.f32 %v234_v14, 0.0  ;;  %v239_v28 = vadd.f32 %v2812_v8, %v168_v9 }
  0x17   :  { %385 = vperm.xlu0 %2728, %v2862_v48   ;;  %v238_v30 = vadd.f32 %v2812_v8, %v167_v10  ;;  %v241_v32 = vadd.f32 %v2812_v8, %v170_v15  ;;  %v240_v33 = vadd.f32 %v2812_v8, %v169_v16  ;;  %v243_v35 = vadd.f32 %v2812_v8, %v172_v17 }
  0x18   :  { %4396 = vst [vmem:[#allocation6_spill] sm:$0xff] %v2907_v27  ;;  %v242_v36 = vadd.f32 %v2812_v8, %v171_v18  ;;  %v245_v38 = vadd.f32 %v2812_v8, %v174_v19  ;;  %v244_v40 = vadd.f32 %v2812_v8, %v173_v20  ;;  %v247_v41 = vadd.f32 %v2812_v8, %v176_v21 }
  0x19   :  { %v246_v42 = vadd.f32 %v2812_v8, %v175_v22  ;;  %v2923_v43 = vmax.f32 %v237_v23, 0.0  ;;  %v2925_v44 = vmax.f32 %v236_v24, 0.0  ;;  %v2928_v45 = vmax.f32 %v239_v28, 0.0  ;;  %v2673_v22 = vld [vmem:[%s4358_s0 + $0x78] sm:$0xff]  }
  0x1a   :  { %400 = vperm.xlu1 %2729, %v2887_v11   ;;  %v2930_v49 = vmax.f32 %v238_v30, 0.0  ;;  %v2422_v50 = vunpack.c.h.bf16 %v2670_v37  ;;  %v2421_v51 = vunpack.c.l.bf16 %v2670_v37  ;;  %v2939_v54 = vmax.f32 %v241_v32, 0.0 }
  0x1b   :  { %395 = vperm.xlu0 %2728, %v2889_v12   ;;  %4397 = vst [vmem:[#allocation7_spill] sm:$0xff] %v2923_v43  ;;  %4398 = vst [vmem:[#allocation8_spill] sm:$0xff] %v2925_v44  ;;  %v2941_v55 = vmax.f32 %v240_v33, 0.0  ;;  %v2943_v56 = vmax.f32 %v243_v35, 0.0  ;;  %v2945_v57 = vmax.f32 %v242_v36, 0.0  ;;  %v2950_v59 = vmax.f32 %v245_v38, 0.0 }
  0x1c   :  { %4399 = vst [vmem:[#allocation9_spill] sm:$0xff] %v2928_v45  ;;  %4400 = vst [vmem:[#allocation10_spill] sm:$0xff] %v2930_v49  ;;  %v2952_v60 = vmax.f32 %v244_v40, 0.0  ;;  %v2954_v61 = vmax.f32 %v247_v41, 0.0  ;;  %v2956_v62 = vmax.f32 %v246_v42, 0.0  ;;  %v2426_v2 = vunpack.c.h.bf16 %v2671_v52  ;;  %v2678_v42 = vld [vmem:[%s4358_s0 + $0xa0] sm:$0xff]  }
  0x1d   :  { %4401 = vst [vmem:[#allocation11_spill] sm:$0xff] %v2939_v54  ;;  %4402 = vst [vmem:[#allocation12_spill] sm:$0xff] %v2941_v55  ;;  %v2425_v3 = vunpack.c.l.bf16 %v2671_v52  ;;  %v2430_v4 = vunpack.c.h.bf16 %v2672_v53  ;;  %v2429_v5 = vunpack.c.l.bf16 %v2672_v53  ;;  %v178_v7 = vmul.f32 %v2422_v50, %v2798_v1 }
  0x1e   :  { %410 = vperm.xlu1 %2729, %v2905_v25   ;;  %4403 = vst [vmem:[#allocation13_spill] sm:$0xff] %v2943_v56  ;;  %4404 = vst [vmem:[#allocation14_spill] sm:$0xff] %v2945_v57  ;;  %v177_v9 = vmul.f32 %v2421_v51, %v2798_v1  ;;  %v2438_v10 = vunpack.c.h.bf16 %v2674_v58  ;;  %v2437_v13 = vunpack.c.l.bf16 %v2674_v58  ;;  %v2442_v14 = vunpack.c.h.bf16 %v2675_v63  ;;  %v2679_v58 = vld [vmem:[%s4358_s0 + $0xa8] sm:$0xff]  }
  0x1f   :  { %405 = vperm.xlu0 %2728, %v2907_v27   ;;  %4405 = vst [vmem:[#allocation15_spill] sm:$0xff] %v2950_v59  ;;  %4406 = vst [vmem:[#allocation16_spill] sm:$0xff] %v2952_v60  ;;  %v2441_v15 = vunpack.c.l.bf16 %v2675_v63  ;;  %v2446_v16 = vunpack.c.h.bf16 %v2676_v0  ;;  %v2445_v17 = vunpack.c.l.bf16 %v2676_v0  ;;  %v2450_v20 = vunpack.c.h.bf16 %v2677_v6  ;;  %v2680_v63 = vld [vmem:[%s4358_s0 + $0xb0] sm:$0xff]  }
  0x20   :  { %4407 = vst [vmem:[#allocation17_spill] sm:$0xff] %v2954_v61  ;;  %4408 = vst [vmem:[#allocation18_spill] sm:$0xff] %v2956_v62  ;;  %v186_v18 = vmul.f32 %v2438_v10, %v2798_v1  ;;  %v185_v19 = vmul.f32 %v2437_v13, %v2798_v1  ;;  %v2449_v21 = vunpack.c.l.bf16 %v2677_v6  ;;  %v188_v23 = vmul.f32 %v2442_v14, %v2798_v1  ;;  %v2681_v14 = vld [vmem:[%s4358_s0 + $0xb8] sm:$0xff]  }
  0x21   :  { %v187_v24 = vmul.f32 %v2441_v15, %v2798_v1  ;;  %v190_v28 = vmul.f32 %v2446_v16, %v2798_v1  ;;  %v189_v30 = vmul.f32 %v2445_v17, %v2798_v1  ;;  %v192_v35 = vmul.f32 %v2450_v20, %v2798_v1 }
  0x22   :  { %420 = vperm.xlu1 %2729, %v2923_v43   ;;  %v2982_v32 = vadd.f32 %v2812_v8, %v186_v18  ;;  %v2985_v33 = vadd.f32 %v2812_v8, %v185_v19  ;;  %v191_v36 = vmul.f32 %v2449_v21, %v2798_v1  ;;  %v2991_v37 = vadd.f32 %v2812_v8, %v188_v23 }
  0x23   :  { %415 = vperm.xlu0 %2728, %v2925_v44   ;;  %v2994_v38 = vadd.f32 %v2812_v8, %v187_v24  ;;  %v2997_v40 = vadd.f32 %v2812_v8, %v190_v28  ;;  %v3000_v41 = vadd.f32 %v2812_v8, %v189_v30  ;;  %v2434_v50 = vunpack.c.h.bf16 %v2673_v22 }
  0x24   :  { %v2433_v51 = vunpack.c.l.bf16 %v2673_v22  ;;  %v3006_v52 = vadd.f32 %v2812_v8, %v192_v35  ;;  %v3009_v53 = vadd.f32 %v2812_v8, %v191_v36  ;;  %v180_v0 = vmul.f32 %v2426_v2, %v2798_v1 }
  0x25   :  { %v179_v6 = vmul.f32 %v2425_v3, %v2798_v1  ;;  %v182_v10 = vmul.f32 %v2430_v4, %v2798_v1  ;;  %v181_v13 = vmul.f32 %v2429_v5, %v2798_v1  ;;  %v249_v15 = vadd.f32 %v2812_v8, %v178_v7 }
  0x26   :  { %430 = vperm.xlu1 %2729, %v2928_v45   ;;  %v248_v16 = vadd.f32 %v2812_v8, %v177_v9  ;;  %v2454_v17 = vunpack.c.h.bf16 %v2678_v42  ;;  %v2453_v18 = vunpack.c.l.bf16 %v2678_v42  ;;  %v2458_v2 = vunpack.c.h.bf16 %v2679_v58 }
  0x27   :  { %425 = vperm.xlu0 %2728, %v2930_v49   ;;  %v2457_v3 = vunpack.c.l.bf16 %v2679_v58  ;;  %v2462_v19 = vunpack.c.h.bf16 %v2680_v63  ;;  %v2461_v4 = vunpack.c.l.bf16 %v2680_v63  ;;  %v2466_v21 = vunpack.c.h.bf16 %v2681_v14 }
  0x28   :  { %v194_v5 = vmul.f32 %v2454_v17, %v2798_v1  ;;  %v193_v20 = vmul.f32 %v2453_v18, %v2798_v1  ;;  %v2465_v22 = vunpack.c.l.bf16 %v2681_v14  ;;  %v196_v23 = vmul.f32 %v2458_v2, %v2798_v1  ;;  %v2682_v17 = vld [vmem:[%s4358_s0 + $0xc0] sm:$0xff]  }
  0x29   :  { %v195_v7 = vmul.f32 %v2457_v3, %v2798_v1  ;;  %v198_v9 = vmul.f32 %v2462_v19, %v2798_v1  ;;  %v197_v24 = vmul.f32 %v2461_v4, %v2798_v1  ;;  %v200_v35 = vmul.f32 %v2466_v21, %v2798_v1  ;;  %v2683_v4 = vld [vmem:[%s4358_s0 + $0xc8] sm:$0xff]  }
  0x2a   :  { %440 = vperm.xlu1 %2729, %v2939_v54   ;;  %v3036_v28 = vadd.f32 %v2812_v8, %v194_v5  ;;  %v3039_v30 = vadd.f32 %v2812_v8, %v193_v20  ;;  %v199_v36 = vmul.f32 %v2465_v22, %v2798_v1  ;;  %v3045_v42 = vadd.f32 %v2812_v8, %v196_v23  ;;  %v2684_v5 = vld [vmem:[%s4358_s0 + $0xd0] sm:$0xff]   ;;  %v2685_v22 = vld [vmem:[%s4358_s0 + $0xd8] sm:$0xff]  }
  0x2b   :  { %435 = vperm.xlu0 %2728, %v2941_v55   ;;  %v3048_v58 = vadd.f32 %v2812_v8, %v195_v7  ;;  %v3051_v63 = vadd.f32 %v2812_v8, %v198_v9  ;;  %v3054_v14 = vadd.f32 %v2812_v8, %v197_v24  ;;  %v184_v18 = vmul.f32 %v2434_v50, %v2798_v1 }
  0x2c   :  { %v183_v2 = vmul.f32 %v2433_v51, %v2798_v1  ;;  %v3062_v3 = vadd.f32 %v2812_v8, %v200_v35  ;;  %v3065_v19 = vadd.f32 %v2812_v8, %v199_v36  ;;  %v251_v20 = vadd.f32 %v2812_v8, %v180_v0 }
  0x2d   :  { %v250_v50 = vadd.f32 %v2812_v8, %v179_v6  ;;  %v253_v51 = vadd.f32 %v2812_v8, %v182_v10  ;;  %v252_v21 = vadd.f32 %v2812_v8, %v181_v13  ;;  %v3081_v23 = vmax.f32 %v249_v15, 0.0 }
  0x2e   :  { %450 = vperm.xlu1 %2729, %v2943_v56   ;;  %v3083_v7 = vmax.f32 %v248_v16, 0.0  ;;  %v2470_v9 = vunpack.c.h.bf16 %v2682_v17  ;;  %v2469_v24 = vunpack.c.l.bf16 %v2682_v17  ;;  %v2474_v0 = vunpack.c.h.bf16 %v2683_v4 }
  0x2f   :  { %445 = vperm.xlu0 %2728, %v2945_v57   ;;  %4409 = vst [vmem:[#allocation19_spill] sm:$0xff] %v3081_v23  ;;  %v2473_v6 = vunpack.c.l.bf16 %v2683_v4  ;;  %v2478_v35 = vunpack.c.h.bf16 %v2684_v5  ;;  %v2477_v10 = vunpack.c.l.bf16 %v2684_v5  ;;  %v2482_v56 = vunpack.c.h.bf16 %v2685_v22 }
  0x30   :  { %v202_v13 = vmul.f32 %v2470_v9, %v2798_v1  ;;  %v201_v36 = vmul.f32 %v2469_v24, %v2798_v1  ;;  %v2481_v57 = vunpack.c.l.bf16 %v2685_v22 }
  0x31   :  { %v203_v15 = vmul.f32 %v2473_v6, %v2798_v1  ;;  %v206_v16 = vmul.f32 %v2478_v35, %v2798_v1  ;;  %v205_v17 = vmul.f32 %v2477_v10, %v2798_v1  ;;  %v208_v9 = vmul.f32 %v2482_v56, %v2798_v1  ;;  %v2686_v56 = vld [vmem:[%s4358_s0 + $0xe0] sm:$0xff]  }
  0x32   :  { %460 = vperm.xlu1 %2729, %v2950_v59   ;;  %v204_v59 = vmul.f32 %v2474_v0, %v2798_v1  ;;  %v3094_v4 = vadd.f32 %v2812_v8, %v202_v13  ;;  %v3097_v5 = vadd.f32 %v2812_v8, %v201_v36  ;;  %v207_v22 = vmul.f32 %v2481_v57, %v2798_v1  ;;  %v2688_v13 = vld [vmem:[%s4358_s0 + $0xf0] sm:$0xff]  }
  0x33   :  { %455 = vperm.xlu0 %2728, %v2952_v60   ;;  %v3106_v0 = vadd.f32 %v2812_v8, %v203_v15  ;;  %v3109_v6 = vadd.f32 %v2812_v8, %v206_v16  ;;  %v3112_v35 = vadd.f32 %v2812_v8, %v205_v17  ;;  %v3118_v57 = vadd.f32 %v2812_v8, %v208_v9  ;;  %v2689_v9 = vld [vmem:[%s4358_s0 + $0xf8] sm:$0xff]  }
  0x34   :  { %v3103_v24 = vadd.f32 %v2812_v8, %v204_v59  ;;  %v3121_v10 = vadd.f32 %v2812_v8, %v207_v22  ;;  %v2687_v59 = vld [vmem:[%s4358_s0 + $0xe8] sm:$0xff]   ;;  %v3129_v36 = vmax.f32 %v251_v20, 0.0  ;;  %v3131_v15 = vmax.f32 %v250_v50, 0.0 }
  0x35   :  { %v255_v16 = vadd.f32 %v2812_v8, %v184_v18  ;;  %v254_v17 = vadd.f32 %v2812_v8, %v183_v2  ;;  %v3139_v22 = vmax.f32 %v253_v51, 0.0  ;;  %v2485_v60 = vunpack.c.l.bf16 %v2686_v56 }
  0x36   :  { %470 = vperm.xlu1 %2729, %v2954_v61   ;;  %v3141_v61 = vmax.f32 %v252_v21, 0.0  ;;  %v2490_v20 = vunpack.c.h.bf16 %v2687_v59  ;;  %v2489_v50 = vunpack.c.l.bf16 %v2687_v59  ;;  %v2494_v54 = vunpack.c.h.bf16 %v2688_v13 }
  0x37   :  { %465 = vperm.xlu0 %2728, %v2956_v62   ;;  %v2486_v62 = vunpack.c.h.bf16 %v2686_v56  ;;  %v2493_v18 = vunpack.c.l.bf16 %v2688_v13  ;;  %v209_v55 = vmul.f32 %v2485_v60, %v2798_v1  ;;  %v2498_v45 = vunpack.c.h.bf16 %v2689_v9 }
  0x38   :  { %v2497_v49 = vunpack.c.l.bf16 %v2689_v9  ;;  %v211_v51 = vmul.f32 %v2489_v50, %v2798_v1  ;;  %v214_v21 = vmul.f32 %v2494_v54, %v2798_v1 }
  0x39   :  { %v210_v2 = vmul.f32 %v2486_v62, %v2798_v1  ;;  %v213_v56 = vmul.f32 %v2493_v18, %v2798_v1  ;;  %v3155_v13 = vadd.f32 %v2812_v8, %v209_v55  ;;  %v216_v60 = vmul.f32 %v2498_v45, %v2798_v1 }
  0x3a   :  { %480 = vperm.xlu1 %2729, %v3081_v23   ;;  %v212_v23 = vmul.f32 %v2490_v20, %v2798_v1  ;;  %v215_v62 = vmul.f32 %v2497_v49, %v2798_v1  ;;  %v3162_v54 = vadd.f32 %v2812_v8, %v211_v51  ;;  %v3165_v20 = vadd.f32 %v2812_v8, %v214_v21 }
  0x3b   :  { %475 = vperm.xlu0 %2728, %v3083_v7   ;;  %v3152_v59 = vadd.f32 %v2812_v8, %v210_v2  ;;  %v3168_v50 = vadd.f32 %v2812_v8, %v213_v56  ;;  %v3171_v55 = vadd.f32 %v2812_v8, %v216_v60  ;;  %v3177_v1 = vmax.f32 %v255_v16, 0.0 }
  0x3c   :  { %v283_v9 = vadd.f32 %v2812_v8, %v212_v23  ;;  %v3174_v45 = vadd.f32 %v2812_v8, %v215_v62  ;;  %v3180_v49 = vmax.f32 %v254_v17, 0.0  ;;  %v3184_v23 = vmax.f32 %v2982_v32, 0.0 }
  0x3d   :  { %v3188_v18 = vmax.f32 %v2985_v33, 0.0  ;;  %v3192_v8 = vmax.f32 %v2991_v37, 0.0  ;;  %v3196_v16 = vmax.f32 %v2994_v38, 0.0  ;;  %v3200_v32 = vmax.f32 %v2997_v40, 0.0 }
  0x3e   :  { %490 = vperm.xlu1 %2729, %v3129_v36   ;;  %v3204_v33 = vmax.f32 %v3000_v41, 0.0  ;;  %v3208_v37 = vmax.f32 %v3006_v52, 0.0  ;;  %v3212_v38 = vmax.f32 %v3009_v53, 0.0  ;;  %v3216_v40 = vmax.f32 %v3036_v28, 0.0 }
  0x3f   :  { %485 = vperm.xlu0 %2728, %v3131_v15   ;;  %v3220_v41 = vmax.f32 %v3039_v30, 0.0  ;;  %v3224_v52 = vmax.f32 %v3045_v42, 0.0  ;;  %v3228_v53 = vmax.f32 %v3048_v58, 0.0  ;;  %v3232_v28 = vmax.f32 %v3051_v63, 0.0 }
  0x40   :  { %v3236_v30 = vmax.f32 %v3054_v14, 0.0  ;;  %v3240_v42 = vmax.f32 %v3062_v3, 0.0  ;;  %v3244_v58 = vmax.f32 %v3065_v19, 0.0  ;;  %v3248_v63 = vmax.f32 %v3094_v4, 0.0 }
  0x41   :  { %v3252_v14 = vmax.f32 %v3097_v5, 0.0  ;;  %v3256_v3 = vmax.f32 %v3103_v24, 0.0  ;;  %v3260_v19 = vmax.f32 %v3106_v0, 0.0  ;;  %v3264_v4 = vmax.f32 %v3109_v6, 0.0 }
  0x42   :  { %500 = vperm.xlu1 %2729, %v3139_v22   ;;  %v3268_v5 = vmax.f32 %v3112_v35, 0.0  ;;  %v3272_v24 = vmax.f32 %v3118_v57, 0.0  ;;  %v3276_v0 = vmax.f32 %v3121_v10, 0.0  ;;  %v3280_v6 = vmax.f32 %v3152_v59, 0.0 }
  0x43   :  { %495 = vperm.xlu0 %2728, %v3141_v61   ;;  %v3284_v35 = vmax.f32 %v3155_v13, 0.0  ;;  %v3287_v17 = vmax.f32 %v283_v9, 0.0  ;;  %v3291_v57 = vmax.f32 %v3162_v54, 0.0  ;;  %v3295_v10 = vmax.f32 %v3165_v20, 0.0 }
  0x44   :  { %v3299_v2 = vmax.f32 %v3168_v50, 0.0  ;;  %v3303_v51 = vmax.f32 %v3171_v55, 0.0  ;;  %v3307_v21 = vmax.f32 %v3174_v45, 0.0  ;;  %v2761_v13 = vmov 1  }
  0x45   :  { %4410 = vst [vmem:[#allocation20_spill] sm:$0xff] %v3284_v35  ;;  %4411 = vst [vmem:[#allocation21_spill] sm:$0xff] %v3287_v17 }
  0x46   :  { %510 = vperm.xlu1 %2729, %v3177_v1   ;;  %4412 = vst [vmem:[#allocation22_spill] sm:$0xff] %v3299_v2 }
  0x47   :  { %505 = vperm.xlu0 %2728, %v3180_v49  }
  0x4a   :  { %520 = vperm.xlu1 %2729, %v3184_v23  }
  0x4b   :  { %515 = vperm.xlu0 %2728, %v3188_v18  }
  0x4e   :  { %530 = vperm.xlu1 %2729, %v3192_v8  }
  0x4f   :  { %525 = vperm.xlu0 %2728, %v3196_v16  }
  0x52   :  { %540 = vperm.xlu1 %2729, %v3200_v32  }
  0x53   :  { %535 = vperm.xlu0 %2728, %v3204_v33  }
  0x56   :  { %550 = vperm.xlu1 %2729, %v3208_v37  }
  0x57   :  { %545 = vperm.xlu0 %2728, %v3212_v38  }
  0x5a   :  { %560 = vperm.xlu1 %2729, %v3216_v40  }
  0x5b   :  { %555 = vperm.xlu0 %2728, %v3220_v41  }
  0x5e   :  { %570 = vperm.xlu1 %2729, %v3224_v52  }
  0x5f   :  { %565 = vperm.xlu0 %2728, %v3228_v53  }
  0x62   :  { %580 = vperm.xlu1 %2729, %v3232_v28  }
  0x63   :  { %575 = vperm.xlu0 %2728, %v3236_v30  }
  0x66   :  { %590 = vperm.xlu1 %2729, %v3240_v42  }
  0x67   :  { %585 = vperm.xlu0 %2728, %v3244_v58  }
  0x6a   :  { %600 = vperm.xlu1 %2729, %v3248_v63  }
  0x6b   :  { %595 = vperm.xlu0 %2728, %v3252_v14  }
  0x6e   :  { %610 = vperm.xlu1 %2729, %v3256_v3  }
  0x6f   :  { %605 = vperm.xlu0 %2728, %v3260_v19  }
  0x72   :  { %620 = vperm.xlu1 %2729, %v3264_v4  }
  0x73   :  { %615 = vperm.xlu0 %2728, %v3268_v5  }
  0x76   :  { %630 = vperm.xlu1 %2729, %v3272_v24  }
  0x77   :  { %625 = vperm.xlu0 %2728, %v3276_v0  }
  0x7a   :  { %640 = vperm.xlu1 %2729, %v3280_v6  }
  0x7b   :  { %635 = vperm.xlu0 %2728, %v3284_v35  }
  0x7e   :  { %650 = vperm.xlu1 %2729, %v3287_v17  }
  0x7f   :  { %645 = vperm.xlu0 %2728, %v3291_v57  }
  0x82   :  { %660 = vperm.xlu1 %2729, %v3295_v10  }
  0x83   :  { %655 = vperm.xlu0 %2728, %v3299_v2  }
  0x86   :  { %670 = vperm.xlu1 %2729, %v3303_v51  }
  0x87   :  { %665 = vperm.xlu0 %2728, %v3307_v21  }
  0x89   :  { %v3311_v56 = vpop.permute.xlu1 %365 }
  0x8a   :  { %4413 = vst [vmem:[#allocation23_spill] sm:$0xff] %v3311_v56  ;;  %v3313_v59 = vpop.permute.xlu0 %355  ;;  %2731 = vset.pattern.permute.xlu1 %v2761_v13  ;;  %v4433_v56 = vld [vmem:[#allocation12_spill] sm:$0xff] }
  0x8b   :  { %4414 = vst [vmem:[#allocation24_spill] sm:$0xff] %v3313_v59  ;;  %2730 = vset.pattern.permute.xlu0 %v2761_v13  ;;  %746 = vperm.xlu1 %2731, %v2838_v34   ;;  %v4437_v59 = vld [vmem:[#allocation14_spill] sm:$0xff] }
  0x8c   :  { %742 = vperm.xlu0 %2730, %v2831_v29  }
  0x8d   :  { %v3317_v60 = vpop.permute.xlu1 %370 }
  0x8e   :  { %4415 = vst [vmem:[#allocation25_spill] sm:$0xff] %v3317_v60  ;;  %v3319_v62 = vpop.permute.xlu0 %360 }
  0x8f   :  { %4416 = vst [vmem:[#allocation26_spill] sm:$0xff] %v3319_v62  ;;  %750 = vperm.xlu1 %2731, %v2827_v26  }
  0x90   :  { %754 = vperm.xlu0 %2730, %v2835_v31  }
  0x91   :  { %v3323_v9 = vpop.permute.xlu1 %380 }
  0x92   :  { %4417 = vst [vmem:[#allocation27_spill] sm:$0xff] %v3323_v9  ;;  %v3325_v54 = vpop.permute.xlu0 %375  ;;  %v4429_v9 = vld [vmem:[#allocation10_spill] sm:$0xff] }
  0x93   :  { %4418 = vst [vmem:[#allocation28_spill] sm:$0xff] %v3325_v54  ;;  %758 = vperm.xlu1 %2731, %v2858_v46  }
  0x94   :  { %762 = vperm.xlu0 %2730, %v2846_v39  }
  0x95   :  { %v3329_v20 = vpop.permute.xlu1 %390 }
  0x96   :  { %4419 = vst [vmem:[#allocation29_spill] sm:$0xff] %v3329_v20  ;;  %v3331_v50 = vpop.permute.xlu0 %385 }
  0x97   :  { %4420 = vst [vmem:[#allocation30_spill] sm:$0xff] %v3331_v50  ;;  %766 = vperm.xlu1 %2731, %v2862_v48  }
  0x98   :  { %770 = vperm.xlu0 %2730, %v2860_v47  }
  0x99   :  { %v3335_v55 = vpop.permute.xlu1 %400 }
  0x9a   :  { %4421 = vst [vmem:[#allocation31_spill] sm:$0xff] %v3335_v55  ;;  %v3337_v45 = vpop.permute.xlu0 %395 }
  0x9b   :  { %4422 = vst [vmem:[#allocation32_spill] sm:$0xff] %v3337_v45  ;;  %774 = vperm.xlu1 %2731, %v2889_v12  }
  0x9c   :  { %778 = vperm.xlu0 %2730, %v2887_v11  }
  0x9d   :  { %v3341_v13 = vpop.permute.xlu1 %410 }
  0x9e   :  { %4423 = vst [vmem:[#allocation33_spill] sm:$0xff] %v3341_v13  ;;  %v3343_v54 = vpop.permute.xlu0 %405  ;;  %v4430_v13 = vld [vmem:[#allocation9_spill] sm:$0xff] }
  0x9f   :  { %4424 = vst [vmem:[#allocation34_spill] sm:$0xff] %v3343_v54  ;;  %782 = vperm.xlu1 %2731, %v2907_v27  }
  0xa0   :  { %786 = vperm.xlu0 %2730, %v2905_v25  }
  0xa1   :  { %v3347_v50 = vpop.permute.xlu1 %420 }
  0xa2   :  { %4425 = vst [vmem:[#allocation35_spill] sm:$0xff] %v3347_v50  ;;  %v3349_v20 = vpop.permute.xlu0 %415  ;;  %v4434_v50 = vld [vmem:[#allocation11_spill] sm:$0xff] }
  0xa3   :  { %4426 = vst [vmem:[#allocation36_spill] sm:$0xff] %v3349_v20  ;;  %790 = vperm.xlu1 %2731, %v2925_v44  }
  0xa4   :  { %794 = vperm.xlu0 %2730, %v2923_v43  }
  0xa5   :  { %v3353_v45 = vpop.permute.xlu1 %430 }
  0xa6   :  { %4427 = vst [vmem:[#allocation37_spill] sm:$0xff] %v3353_v45  ;;  %v3355_v55 = vpop.permute.xlu0 %425  ;;  %v4438_v45 = vld [vmem:[#allocation13_spill] sm:$0xff] }
  0xa7   :  { %4428 = vst [vmem:[#allocation38_spill] sm:$0xff] %v3355_v55  ;;  %798 = vperm.xlu1 %2731, %v4429_v9  }
  0xa8   :  { %802 = vperm.xlu0 %2730, %v4430_v13   ;;  %v4441_v13 = vld [vmem:[#allocation16_spill] sm:$0xff] }
  0xa9   :  { %v3359_v54 = vpop.permute.xlu1 %440 }
  0xaa   :  { %4431 = vst [vmem:[#allocation39_spill] sm:$0xff] %v3359_v54  ;;  %v3361_v60 = vpop.permute.xlu0 %435  ;;  %v4442_v54 = vld [vmem:[#allocation15_spill] sm:$0xff] }
  0xab   :  { %4432 = vst [vmem:[#allocation40_spill] sm:$0xff] %v3361_v60  ;;  %806 = vperm.xlu1 %2731, %v4433_v56  }
  0xac   :  { %810 = vperm.xlu0 %2730, %v4434_v50   ;;  %v4445_v50 = vld [vmem:[#allocation18_spill] sm:$0xff] }
  0xad   :  { %v3365_v20 = vpop.permute.xlu1 %450 }
  0xae   :  { %4435 = vst [vmem:[#allocation41_spill] sm:$0xff] %v3365_v20  ;;  %v3367_v62 = vpop.permute.xlu0 %445  ;;  %v4446_v20 = vld [vmem:[#allocation17_spill] sm:$0xff] }
  0xaf   :  { %4436 = vst [vmem:[#allocation42_spill] sm:$0xff] %v3367_v62  ;;  %814 = vperm.xlu1 %2731, %v4437_v59  }
  0xb0   :  { %818 = vperm.xlu0 %2730, %v4438_v45  }
  0xb1   :  { %v3371_v55 = vpop.permute.xlu1 %460 }
  0xb2   :  { %4439 = vst [vmem:[#allocation43_spill] sm:$0xff] %v3371_v55  ;;  %v3373_v43 = vpop.permute.xlu0 %455  ;;  %v4449_v55 = vld [vmem:[#allocation19_spill] sm:$0xff] }
  0xb3   :  { %4440 = vst [vmem:[#allocation44_spill] sm:$0xff] %v3373_v43  ;;  %822 = vperm.xlu1 %2731, %v4441_v13  }
  0xb4   :  { %826 = vperm.xlu0 %2730, %v4442_v54  }
  0xb5   :  { %v3377_v60 = vpop.permute.xlu1 %470 }
  0xb6   :  { %4443 = vst [vmem:[#allocation16_spill] sm:$0xff] %v3377_v60  ;;  %v3379_v56 = vpop.permute.xlu0 %465 }
  0xb7   :  { %4444 = vst [vmem:[#allocation15_spill] sm:$0xff] %v3379_v56  ;;  %830 = vperm.xlu1 %2731, %v4445_v50  }
  0xb8   :  { %834 = vperm.xlu0 %2730, %v4446_v20  }
  0xb9   :  { %v3383_v62 = vpop.permute.xlu1 %480 }
  0xba   :  { %4447 = vst [vmem:[#allocation18_spill] sm:$0xff] %v3383_v62  ;;  %v3385_v59 = vpop.permute.xlu0 %475 }
  0xbb   :  { %4448 = vst [vmem:[#allocation17_spill] sm:$0xff] %v3385_v59  ;;  %838 = vperm.xlu1 %2731, %v3083_v7  }
  0xbc   :  { %842 = vperm.xlu0 %2730, %v4449_v55  }
  0xbd   :  { %v3389_v43 = vpop.permute.xlu1 %490 }
  0xbe   :  { %4450 = vst [vmem:[#allocation19_spill] sm:$0xff] %v3389_v43  ;;  %v3391_v45 = vpop.permute.xlu0 %485 }
  0xbf   :  { %4451 = vst [vmem:[#allocation45_spill] sm:$0xff] %v3391_v45  ;;  %846 = vperm.xlu1 %2731, %v3131_v15  }
  0xc0   :  { %850 = vperm.xlu0 %2730, %v3129_v36  }
  0xc1   :  { %v3395_v56 = vpop.permute.xlu1 %500 }
  0xc2   :  { %4452 = vst [vmem:[#allocation46_spill] sm:$0xff] %v3395_v56  ;;  %v3397_v60 = vpop.permute.xlu0 %495 }
  0xc3   :  { %4453 = vst [vmem:[#allocation47_spill] sm:$0xff] %v3397_v60  ;;  %854 = vperm.xlu1 %2731, %v3141_v61  }
  0xc4   :  { %858 = vperm.xlu0 %2730, %v3139_v22  }
  0xc5   :  { %v3401_v59 = vpop.permute.xlu1 %510 }
  0xc6   :  { %4454 = vst [vmem:[#allocation48_spill] sm:$0xff] %v3401_v59  ;;  %v3403_v62 = vpop.permute.xlu0 %505 }
  0xc7   :  { %4455 = vst [vmem:[#allocation49_spill] sm:$0xff] %v3403_v62  ;;  %862 = vperm.xlu1 %2731, %v3180_v49  }
  0xc8   :  { %866 = vperm.xlu0 %2730, %v3177_v1  }
  0xc9   :  { %v3407_v45 = vpop.permute.xlu1 %520 }
  0xca   :  { %4456 = vst [vmem:[#allocation50_spill] sm:$0xff] %v3407_v45  ;;  %v3409_v43 = vpop.permute.xlu0 %515 }
  0xcb   :  { %4457 = vst [vmem:[#allocation51_spill] sm:$0xff] %v3409_v43  ;;  %870 = vperm.xlu1 %2731, %v3188_v18  }
  0xcc   :  { %874 = vperm.xlu0 %2730, %v3184_v23  }
  0xcd   :  { %v3413_v60 = vpop.permute.xlu1 %530 }
  0xce   :  { %4458 = vst [vmem:[#allocation52_spill] sm:$0xff] %v3413_v60  ;;  %v3415_v56 = vpop.permute.xlu0 %525 }
  0xcf   :  { %4459 = vst [vmem:[#allocation53_spill] sm:$0xff] %v3415_v56  ;;  %878 = vperm.xlu1 %2731, %v3196_v16  }
  0xd0   :  { %882 = vperm.xlu0 %2730, %v3192_v8  }
  0xd1   :  { %v3419_v62 = vpop.permute.xlu1 %540 }
  0xd2   :  { %4460 = vst [vmem:[#allocation54_spill] sm:$0xff] %v3419_v62  ;;  %v3421_v59 = vpop.permute.xlu0 %535 }
  0xd3   :  { %4461 = vst [vmem:[#allocation55_spill] sm:$0xff] %v3421_v59  ;;  %886 = vperm.xlu1 %2731, %v3204_v33  }
  0xd4   :  { %890 = vperm.xlu0 %2730, %v3200_v32  }
  0xd5   :  { %v3425_v43 = vpop.permute.xlu1 %550 }
  0xd6   :  { %4462 = vst [vmem:[#allocation56_spill] sm:$0xff] %v3425_v43  ;;  %v3427_v45 = vpop.permute.xlu0 %545 }
  0xd7   :  { %4463 = vst [vmem:[#allocation57_spill] sm:$0xff] %v3427_v45  ;;  %894 = vperm.xlu1 %2731, %v3212_v38  }
  0xd8   :  { %898 = vperm.xlu0 %2730, %v3208_v37  }
  0xd9   :  { %v3431_v56 = vpop.permute.xlu1 %560 }
  0xda   :  { %4464 = vst [vmem:[#allocation58_spill] sm:$0xff] %v3431_v56  ;;  %v3433_v60 = vpop.permute.xlu0 %555 }
  0xdb   :  { %4465 = vst [vmem:[#allocation59_spill] sm:$0xff] %v3433_v60  ;;  %902 = vperm.xlu1 %2731, %v3220_v41  }
  0xdc   :  { %906 = vperm.xlu0 %2730, %v3216_v40  }
  0xdd   :  { %v3437_v59 = vpop.permute.xlu1 %570 }
  0xde   :  { %4466 = vst [vmem:[#allocation60_spill] sm:$0xff] %v3437_v59  ;;  %v3439_v62 = vpop.permute.xlu0 %565 }
  0xdf   :  { %4467 = vst [vmem:[#allocation61_spill] sm:$0xff] %v3439_v62  ;;  %910 = vperm.xlu1 %2731, %v3228_v53  }
  0xe0   :  { %914 = vperm.xlu0 %2730, %v3224_v52  }
  0xe1   :  { %v3443_v45 = vpop.permute.xlu1 %580 }
  0xe2   :  { %4468 = vst [vmem:[#allocation62_spill] sm:$0xff] %v3443_v45  ;;  %v3445_v43 = vpop.permute.xlu0 %575 }
  0xe3   :  { %4469 = vst [vmem:[#allocation63_spill] sm:$0xff] %v3445_v43  ;;  %918 = vperm.xlu1 %2731, %v3236_v30  }
  0xe4   :  { %922 = vperm.xlu0 %2730, %v3232_v28  }
  0xe5   :  { %v3449_v60 = vpop.permute.xlu1 %590 }
  0xe6   :  { %4470 = vst [vmem:[#allocation64_spill] sm:$0xff] %v3449_v60  ;;  %v3451_v56 = vpop.permute.xlu0 %585 }
  0xe7   :  { %4471 = vst [vmem:[#allocation65_spill] sm:$0xff] %v3451_v56  ;;  %926 = vperm.xlu1 %2731, %v3244_v58  }
  0xe8   :  { %930 = vperm.xlu0 %2730, %v3240_v42  }
  0xe9   :  { %v3455_v62 = vpop.permute.xlu1 %600 }
  0xea   :  { %4472 = vst [vmem:[#allocation66_spill] sm:$0xff] %v3455_v62  ;;  %v3457_v59 = vpop.permute.xlu0 %595 }
  0xeb   :  { %4473 = vst [vmem:[#allocation67_spill] sm:$0xff] %v3457_v59  ;;  %934 = vperm.xlu1 %2731, %v3252_v14  }
  0xec   :  { %938 = vperm.xlu0 %2730, %v3248_v63  }
  0xed   :  { %v3461_v43 = vpop.permute.xlu1 %610 }
  0xee   :  { %4474 = vst [vmem:[#allocation68_spill] sm:$0xff] %v3461_v43  ;;  %v3463_v45 = vpop.permute.xlu0 %605 }
  0xef   :  { %4475 = vst [vmem:[#allocation69_spill] sm:$0xff] %v3463_v45  ;;  %942 = vperm.xlu1 %2731, %v3260_v19  }
  0xf0   :  { %946 = vperm.xlu0 %2730, %v3256_v3  }
  0xf1   :  { %v3467_v56 = vpop.permute.xlu1 %620 }
  0xf2   :  { %4476 = vst [vmem:[#allocation70_spill] sm:$0xff] %v3467_v56  ;;  %v3469_v60 = vpop.permute.xlu0 %615 }
  0xf3   :  { %4477 = vst [vmem:[#allocation71_spill] sm:$0xff] %v3469_v60  ;;  %950 = vperm.xlu1 %2731, %v3268_v5  }
  0xf4   :  { %954 = vperm.xlu0 %2730, %v3264_v4  }
  0xf5   :  { %v3473_v59 = vpop.permute.xlu1 %630 }
  0xf6   :  { %4478 = vst [vmem:[#allocation72_spill] sm:$0xff] %v3473_v59  ;;  %v3475_v62 = vpop.permute.xlu0 %625 }
  0xf7   :  { %4479 = vst [vmem:[#allocation73_spill] sm:$0xff] %v3475_v62  ;;  %958 = vperm.xlu1 %2731, %v3276_v0  }
  0xf8   :  { %962 = vperm.xlu0 %2730, %v3272_v24  }
  0xf9   :  { %v3479_v45 = vpop.permute.xlu1 %640 }
  0xfa   :  { %4480 = vst [vmem:[#allocation74_spill] sm:$0xff] %v3479_v45  ;;  %v3481_v43 = vpop.permute.xlu0 %635 }
  0xfb   :  { %4481 = vst [vmem:[#allocation75_spill] sm:$0xff] %v3481_v43  ;;  %966 = vperm.xlu1 %2731, %v3284_v35  }
  0xfc   :  { %970 = vperm.xlu0 %2730, %v3280_v6  }
  0xfd   :  { %v3485_v60 = vpop.permute.xlu1 %650 }
  0xfe   :  { %4482 = vst [vmem:[#allocation76_spill] sm:$0xff] %v3485_v60  ;;  %v3487_v56 = vpop.permute.xlu0 %645 }
  0xff   :  { %4483 = vst [vmem:[#allocation77_spill] sm:$0xff] %v3487_v56  ;;  %974 = vperm.xlu1 %2731, %v3291_v57  }
 0x100   :  { %978 = vperm.xlu0 %2730, %v3287_v17   ;;  %v2762_v17 = vmov 2  }
 0x101   :  { %v3491_v62 = vpop.permute.xlu1 %660 }
 0x102   :  { %4484 = vst [vmem:[#allocation78_spill] sm:$0xff] %v3491_v62  ;;  %v3493_v59 = vpop.permute.xlu0 %655 }
 0x103   :  { %4485 = vst [vmem:[#allocation79_spill] sm:$0xff] %v3493_v59  ;;  %982 = vperm.xlu1 %2731, %v3299_v2  }
 0x104   :  { %986 = vperm.xlu0 %2730, %v3295_v10  }
 0x105   :  { %v3497_v43 = vpop.permute.xlu1 %670 }
 0x106   :  { %4486 = vst [vmem:[#allocation80_spill] sm:$0xff] %v3497_v43  ;;  %v3499_v45 = vpop.permute.xlu0 %665 }
 0x107   :  { %4487 = vst [vmem:[#allocation81_spill] sm:$0xff] %v3499_v45  ;;  %990 = vperm.xlu1 %2731, %v3307_v21  }
 0x108   :  { %994 = vperm.xlu0 %2730, %v3303_v51  }
 0x10a   :  { %v3503_v56 = vpop.permute.xlu1 %746 }
 0x10b   :  { %4488 = vst [vmem:[#allocation82_spill] sm:$0xff] %v3503_v56  ;;  %v3505_v60 = vpop.permute.xlu0 %742  ;;  %2732 = vset.pattern.permute.xlu1 %v2762_v17  ;;  %v4504_v56 = vld [vmem:[#allocation7_spill] sm:$0xff] }
 0x10c   :  { %4489 = vst [vmem:[#allocation83_spill] sm:$0xff] %v3505_v60  ;;  %2733 = vset.pattern.permute.xlu0 %v2762_v17  ;;  %1130 = vperm.xlu1 %2732, %v2831_v29  }
 0x10d   :  { %1134 = vperm.xlu0 %2733, %v2838_v34  }
 0x10e   :  { %v3509_v59 = vpop.permute.xlu1 %750 }
 0x10f   :  { %4490 = vst [vmem:[#allocation84_spill] sm:$0xff] %v3509_v59  ;;  %v3511_v43 = vpop.permute.xlu0 %754 }
 0x110   :  { %4491 = vst [vmem:[#allocation85_spill] sm:$0xff] %v3511_v43  ;;  %1138 = vperm.xlu1 %2732, %v2827_v26  }
 0x111   :  { %1146 = vperm.xlu0 %2733, %v2858_v46  }
 0x112   :  { %v3515_v45 = vpop.permute.xlu1 %758 }
 0x113   :  { %4492 = vst [vmem:[#allocation86_spill] sm:$0xff] %v3515_v45  ;;  %v3517_v62 = vpop.permute.xlu0 %762 }
 0x114   :  { %4493 = vst [vmem:[#allocation87_spill] sm:$0xff] %v3517_v62  ;;  %1142 = vperm.xlu1 %2732, %v2835_v31  }
 0x115   :  { %1154 = vperm.xlu0 %2733, %v2862_v48  }
 0x116   :  { %v3521_v17 = vpop.permute.xlu1 %766 }
 0x117   :  { %4494 = vst [vmem:[#allocation88_spill] sm:$0xff] %v3521_v17  ;;  %v3523_v60 = vpop.permute.xlu0 %770 }
 0x118   :  { %4495 = vst [vmem:[#allocation89_spill] sm:$0xff] %v3523_v60  ;;  %1150 = vperm.xlu1 %2732, %v2846_v39  }
 0x119   :  { %1162 = vperm.xlu0 %2733, %v2889_v12  }
 0x11a   :  { %v3527_v43 = vpop.permute.xlu1 %774 }
 0x11b   :  { %4496 = vst [vmem:[#allocation90_spill] sm:$0xff] %v3527_v43  ;;  %v3529_v59 = vpop.permute.xlu0 %778 }
 0x11c   :  { %4497 = vst [vmem:[#allocation91_spill] sm:$0xff] %v3529_v59  ;;  %1158 = vperm.xlu1 %2732, %v2860_v47  }
 0x11d   :  { %1170 = vperm.xlu0 %2733, %v2907_v27  }
 0x11e   :  { %v3533_v62 = vpop.permute.xlu1 %782 }
 0x11f   :  { %4498 = vst [vmem:[#allocation92_spill] sm:$0xff] %v3533_v62  ;;  %v3535_v45 = vpop.permute.xlu0 %786  ;;  %v4505_v62 = vld [vmem:[#allocation12_spill] sm:$0xff] }
 0x120   :  { %4499 = vst [vmem:[#allocation93_spill] sm:$0xff] %v3535_v45  ;;  %1166 = vperm.xlu1 %2732, %v2887_v11  }
 0x121   :  { %1178 = vperm.xlu0 %2733, %v2925_v44   ;;  %v4508_v44 = vld [vmem:[#allocation9_spill] sm:$0xff] }
 0x122   :  { %v3539_v60 = vpop.permute.xlu1 %790 }
 0x123   :  { %4500 = vst [vmem:[#allocation94_spill] sm:$0xff] %v3539_v60  ;;  %v3541_v17 = vpop.permute.xlu0 %794  ;;  %v4509_v60 = vld [vmem:[#allocation14_spill] sm:$0xff] }
 0x124   :  { %4501 = vst [vmem:[#allocation95_spill] sm:$0xff] %v3541_v17  ;;  %1174 = vperm.xlu1 %2732, %v2905_v25  }
 0x125   :  { %1186 = vperm.xlu0 %2733, %v4429_v9   ;;  %v4512_v9 = vld [vmem:[#allocation11_spill] sm:$0xff] }
 0x126   :  { %v3545_v59 = vpop.permute.xlu1 %798 }
 0x127   :  { %4502 = vst [vmem:[#allocation96_spill] sm:$0xff] %v3545_v59  ;;  %v3547_v43 = vpop.permute.xlu0 %802 }
 0x128   :  { %4503 = vst [vmem:[#allocation97_spill] sm:$0xff] %v3547_v43  ;;  %1182 = vperm.xlu1 %2732, %v4504_v56  }
 0x129   :  { %1194 = vperm.xlu0 %2733, %v4505_v62   ;;  %v4515_v62 = vld [vmem:[#allocation13_spill] sm:$0xff] }
 0x12a   :  { %v3551_v45 = vpop.permute.xlu1 %806 }
 0x12b   :  { %4506 = vst [vmem:[#allocation7_spill] sm:$0xff] %v3551_v45  ;;  %v3553_v27 = vpop.permute.xlu0 %810 }
 0x12c   :  { %4507 = vst [vmem:[#allocation98_spill] sm:$0xff] %v3553_v27  ;;  %1190 = vperm.xlu1 %2732, %v4508_v44  }
 0x12d   :  { %1202 = vperm.xlu0 %2733, %v4509_v60  }
 0x12e   :  { %v3557_v17 = vpop.permute.xlu1 %814 }
 0x12f   :  { %4510 = vst [vmem:[#allocation9_spill] sm:$0xff] %v3557_v17  ;;  %v3559_v12 = vpop.permute.xlu0 %818 }
 0x130   :  { %4511 = vst [vmem:[#allocation14_spill] sm:$0xff] %v3559_v12  ;;  %1198 = vperm.xlu1 %2732, %v4512_v9  }
 0x131   :  { %1210 = vperm.xlu0 %2733, %v4441_v13  }
 0x132   :  { %v3563_v43 = vpop.permute.xlu1 %822 }
 0x133   :  { %4513 = vst [vmem:[#allocation11_spill] sm:$0xff] %v3563_v43  ;;  %v3565_v59 = vpop.permute.xlu0 %826 }
 0x134   :  { %4514 = vst [vmem:[#allocation99_spill] sm:$0xff] %v3565_v59  ;;  %1206 = vperm.xlu1 %2732, %v4515_v62  }
 0x135   :  { %1218 = vperm.xlu0 %2733, %v4445_v50  }
 0x136   :  { %v3569_v27 = vpop.permute.xlu1 %830 }
 0x137   :  { %4516 = vst [vmem:[#allocation13_spill] sm:$0xff] %v3569_v27  ;;  %v3571_v45 = vpop.permute.xlu0 %834 }
 0x138   :  { %4517 = vst [vmem:[#allocation100_spill] sm:$0xff] %v3571_v45  ;;  %1214 = vperm.xlu1 %2732, %v4442_v54  }
 0x139   :  { %1226 = vperm.xlu0 %2733, %v3083_v7  }
 0x13a   :  { %v3575_v12 = vpop.permute.xlu1 %838 }
 0x13b   :  { %4518 = vst [vmem:[#allocation101_spill] sm:$0xff] %v3575_v12  ;;  %v3577_v17 = vpop.permute.xlu0 %842 }
 0x13c   :  { %4519 = vst [vmem:[#allocation102_spill] sm:$0xff] %v3577_v17  ;;  %1222 = vperm.xlu1 %2732, %v4446_v20  }
 0x13d   :  { %1234 = vperm.xlu0 %2733, %v3131_v15  }
 0x13e   :  { %v3581_v59 = vpop.permute.xlu1 %846 }
 0x13f   :  { %4520 = vst [vmem:[#allocation103_spill] sm:$0xff] %v3581_v59  ;;  %v3583_v43 = vpop.permute.xlu0 %850 }
 0x140   :  { %4521 = vst [vmem:[#allocation104_spill] sm:$0xff] %v3583_v43  ;;  %1230 = vperm.xlu1 %2732, %v4449_v55  }
 0x141   :  { %1242 = vperm.xlu0 %2733, %v3141_v61  }
 0x142   :  { %v3587_v45 = vpop.permute.xlu1 %854 }
 0x143   :  { %4522 = vst [vmem:[#allocation105_spill] sm:$0xff] %v3587_v45  ;;  %v3589_v27 = vpop.permute.xlu0 %858 }
 0x144   :  { %4523 = vst [vmem:[#allocation106_spill] sm:$0xff] %v3589_v27  ;;  %1238 = vperm.xlu1 %2732, %v3129_v36  }
 0x145   :  { %1250 = vperm.xlu0 %2733, %v3180_v49  }
 0x146   :  { %v3593_v17 = vpop.permute.xlu1 %862 }
 0x147   :  { %4524 = vst [vmem:[#allocation107_spill] sm:$0xff] %v3593_v17  ;;  %v3595_v12 = vpop.permute.xlu0 %866 }
 0x148   :  { %4525 = vst [vmem:[#allocation108_spill] sm:$0xff] %v3595_v12  ;;  %1246 = vperm.xlu1 %2732, %v3139_v22  }
 0x149   :  { %1258 = vperm.xlu0 %2733, %v3188_v18  }
 0x14a   :  { %v3599_v43 = vpop.permute.xlu1 %870 }
 0x14b   :  { %4526 = vst [vmem:[#allocation109_spill] sm:$0xff] %v3599_v43  ;;  %v3601_v59 = vpop.permute.xlu0 %874 }
 0x14c   :  { %4527 = vst [vmem:[#allocation110_spill] sm:$0xff] %v3601_v59  ;;  %1254 = vperm.xlu1 %2732, %v3177_v1  }
 0x14d   :  { %1266 = vperm.xlu0 %2733, %v3196_v16  }
 0x14e   :  { %v3605_v27 = vpop.permute.xlu1 %878 }
 0x14f   :  { %4528 = vst [vmem:[#allocation111_spill] sm:$0xff] %v3605_v27  ;;  %v3607_v45 = vpop.permute.xlu0 %882 }
 0x150   :  { %4529 = vst [vmem:[#allocation112_spill] sm:$0xff] %v3607_v45  ;;  %1262 = vperm.xlu1 %2732, %v3184_v23  }
 0x151   :  { %1274 = vperm.xlu0 %2733, %v3204_v33  }
 0x152   :  { %v3611_v12 = vpop.permute.xlu1 %886 }
 0x153   :  { %4530 = vst [vmem:[#allocation113_spill] sm:$0xff] %v3611_v12  ;;  %v3613_v17 = vpop.permute.xlu0 %890 }
 0x154   :  { %4531 = vst [vmem:[#allocation114_spill] sm:$0xff] %v3613_v17  ;;  %1270 = vperm.xlu1 %2732, %v3192_v8  }
 0x155   :  { %1282 = vperm.xlu0 %2733, %v3212_v38  }
 0x156   :  { %v3617_v59 = vpop.permute.xlu1 %894 }
 0x157   :  { %4532 = vst [vmem:[#allocation115_spill] sm:$0xff] %v3617_v59  ;;  %v3619_v43 = vpop.permute.xlu0 %898 }
 0x158   :  { %4533 = vst [vmem:[#allocation116_spill] sm:$0xff] %v3619_v43  ;;  %1278 = vperm.xlu1 %2732, %v3200_v32  }
 0x159   :  { %1290 = vperm.xlu0 %2733, %v3220_v41  }
 0x15a   :  { %v3623_v45 = vpop.permute.xlu1 %902 }
 0x15b   :  { %4534 = vst [vmem:[#allocation117_spill] sm:$0xff] %v3623_v45  ;;  %v3625_v27 = vpop.permute.xlu0 %906 }
 0x15c   :  { %4535 = vst [vmem:[#allocation118_spill] sm:$0xff] %v3625_v27  ;;  %1286 = vperm.xlu1 %2732, %v3208_v37  }
 0x15d   :  { %1298 = vperm.xlu0 %2733, %v3228_v53  }
 0x15e   :  { %v3629_v17 = vpop.permute.xlu1 %910 }
 0x15f   :  { %4536 = vst [vmem:[#allocation119_spill] sm:$0xff] %v3629_v17  ;;  %v3631_v12 = vpop.permute.xlu0 %914 }
 0x160   :  { %4537 = vst [vmem:[#allocation120_spill] sm:$0xff] %v3631_v12  ;;  %1294 = vperm.xlu1 %2732, %v3216_v40  }
 0x161   :  { %1306 = vperm.xlu0 %2733, %v3236_v30  }
 0x162   :  { %v3635_v43 = vpop.permute.xlu1 %918 }
 0x163   :  { %4538 = vst [vmem:[#allocation121_spill] sm:$0xff] %v3635_v43  ;;  %v3637_v59 = vpop.permute.xlu0 %922 }
 0x164   :  { %4539 = vst [vmem:[#allocation122_spill] sm:$0xff] %v3637_v59  ;;  %1302 = vperm.xlu1 %2732, %v3224_v52  }
 0x165   :  { %1314 = vperm.xlu0 %2733, %v3244_v58  }
 0x166   :  { %v3641_v27 = vpop.permute.xlu1 %926 }
 0x167   :  { %4540 = vst [vmem:[#allocation123_spill] sm:$0xff] %v3641_v27  ;;  %v3643_v45 = vpop.permute.xlu0 %930 }
 0x168   :  { %4541 = vst [vmem:[#allocation124_spill] sm:$0xff] %v3643_v45  ;;  %1310 = vperm.xlu1 %2732, %v3232_v28  }
 0x169   :  { %1322 = vperm.xlu0 %2733, %v3252_v14  }
 0x16a   :  { %v3647_v12 = vpop.permute.xlu1 %934 }
 0x16b   :  { %4542 = vst [vmem:[#allocation125_spill] sm:$0xff] %v3647_v12  ;;  %v3649_v17 = vpop.permute.xlu0 %938 }
 0x16c   :  { %4543 = vst [vmem:[#allocation126_spill] sm:$0xff] %v3649_v17  ;;  %1318 = vperm.xlu1 %2732, %v3240_v42  }
 0x16d   :  { %1330 = vperm.xlu0 %2733, %v3260_v19  }
 0x16e   :  { %v3653_v59 = vpop.permute.xlu1 %942 }
 0x16f   :  { %4544 = vst [vmem:[#allocation127_spill] sm:$0xff] %v3653_v59  ;;  %v3655_v43 = vpop.permute.xlu0 %946 }
 0x170   :  { %4545 = vst [vmem:[#allocation128_spill] sm:$0xff] %v3655_v43  ;;  %1326 = vperm.xlu1 %2732, %v3248_v63  }
 0x171   :  { %1338 = vperm.xlu0 %2733, %v3268_v5  }
 0x172   :  { %v3659_v45 = vpop.permute.xlu1 %950 }
 0x173   :  { %4546 = vst [vmem:[#allocation129_spill] sm:$0xff] %v3659_v45  ;;  %v3661_v27 = vpop.permute.xlu0 %954 }
 0x174   :  { %4547 = vst [vmem:[#allocation130_spill] sm:$0xff] %v3661_v27  ;;  %1334 = vperm.xlu1 %2732, %v3256_v3  }
 0x175   :  { %1346 = vperm.xlu0 %2733, %v3276_v0  }
 0x176   :  { %v3665_v17 = vpop.permute.xlu1 %958 }
 0x177   :  { %4548 = vst [vmem:[#allocation131_spill] sm:$0xff] %v3665_v17  ;;  %v3667_v12 = vpop.permute.xlu0 %962 }
 0x178   :  { %4549 = vst [vmem:[#allocation132_spill] sm:$0xff] %v3667_v12  ;;  %1342 = vperm.xlu1 %2732, %v3264_v4  }
 0x179   :  { %1354 = vperm.xlu0 %2733, %v3284_v35   ;;  %v4556_v35 = vld [vmem:[#allocation21_spill] sm:$0xff] }
 0x17a   :  { %v3671_v43 = vpop.permute.xlu1 %966 }
 0x17b   :  { %4550 = vst [vmem:[#allocation133_spill] sm:$0xff] %v3671_v43  ;;  %v3673_v59 = vpop.permute.xlu0 %970 }
 0x17c   :  { %4551 = vst [vmem:[#allocation134_spill] sm:$0xff] %v3673_v59  ;;  %1350 = vperm.xlu1 %2732, %v3272_v24  }
 0x17d   :  { %1362 = vperm.xlu0 %2733, %v3291_v57  }
 0x17e   :  { %v3677_v27 = vpop.permute.xlu1 %974 }
 0x17f   :  { %4552 = vst [vmem:[#allocation135_spill] sm:$0xff] %v3677_v27  ;;  %v3679_v45 = vpop.permute.xlu0 %978  ;;  %v2763_v27 = vmov 3  }
 0x180   :  { %4553 = vst [vmem:[#allocation136_spill] sm:$0xff] %v3679_v45  ;;  %1358 = vperm.xlu1 %2732, %v3280_v6  }
 0x181   :  { %1370 = vperm.xlu0 %2733, %v3299_v2  }
 0x182   :  { %v3683_v12 = vpop.permute.xlu1 %982 }
 0x183   :  { %4554 = vst [vmem:[#allocation137_spill] sm:$0xff] %v3683_v12  ;;  %v3685_v17 = vpop.permute.xlu0 %986 }
 0x184   :  { %4555 = vst [vmem:[#allocation138_spill] sm:$0xff] %v3685_v17  ;;  %1366 = vperm.xlu1 %2732, %v4556_v35  }
 0x185   :  { %1378 = vperm.xlu0 %2733, %v3307_v21  }
 0x186   :  { %v3689_v59 = vpop.permute.xlu1 %990 }
 0x187   :  { %4557 = vst [vmem:[#allocation21_spill] sm:$0xff] %v3689_v59  ;;  %v3691_v43 = vpop.permute.xlu0 %994 }
 0x188   :  { %4558 = vst [vmem:[#allocation139_spill] sm:$0xff] %v3691_v43  ;;  %1374 = vperm.xlu1 %2732, %v3295_v10  }
 0x189   :  { %2734 = vset.pattern.permute.xlu0 %v2763_v27 }
 0x18a   :  { %1518 = vperm.xlu0 %2734, %v2831_v29  }
 0x18b   :  { %v3695_v45 = vpop.permute.xlu1 %1130 }
 0x18c   :  { %v3697_v2 = vpop.permute.xlu0 %1134  ;;  %1382 = vperm.xlu1 %2732, %v3303_v51  }
 0x18e   :  { %1530 = vperm.xlu0 %2734, %v2835_v31  }
 0x18f   :  { %v3701_v17 = vpop.permute.xlu1 %1138 }
 0x190   :  { %v3703_v12 = vpop.permute.xlu0 %1146  ;;  %2735 = vset.pattern.permute.xlu1 %v2763_v27 }
 0x191   :  { %1522 = vperm.xlu1 %2735, %v2838_v34  }
 0x192   :  { %1538 = vperm.xlu0 %2734, %v2846_v39  }
 0x193   :  { %v3707_v43 = vpop.permute.xlu1 %1142 }
 0x194   :  { %v3709_v29 = vpop.permute.xlu0 %1154 }
 0x195   :  { %1526 = vperm.xlu1 %2735, %v2827_v26  }
 0x196   :  { %1546 = vperm.xlu0 %2734, %v2860_v47   ;;  %v4562_v47 = vld [vmem:[#allocation5_spill] sm:$0xff] }
 0x197   :  { %v3713_v59 = vpop.permute.xlu1 %1150 }
 0x198   :  { %v3715_v31 = vpop.permute.xlu0 %1162 }
 0x199   :  { %4559 = vst [vmem:[#allocation140_spill] sm:$0xff] %v3715_v31  ;;  %1534 = vperm.xlu1 %2735, %v2858_v46  }
 0x19a   :  { %1554 = vperm.xlu0 %2734, %v2887_v11   ;;  %v4564_v11 = vld [vmem:[#allocation6_spill] sm:$0xff] }
 0x19b   :  { %v3719_v27 = vpop.permute.xlu1 %1158 }
 0x19c   :  { %v3721_v34 = vpop.permute.xlu0 %1170 }
 0x19d   :  { %4560 = vst [vmem:[#allocation141_spill] sm:$0xff] %v3721_v34  ;;  %1542 = vperm.xlu1 %2735, %v2862_v48  }
 0x19e   :  { %1562 = vperm.xlu0 %2734, %v2905_v25   ;;  %v4566_v25 = vld [vmem:[#allocation8_spill] sm:$0xff] }
 0x19f   :  { %v3725_v39 = vpop.permute.xlu1 %1166 }
 0x1a0   :  { %v3727_v26 = vpop.permute.xlu0 %1178 }
 0x1a1   :  { %4561 = vst [vmem:[#allocation142_spill] sm:$0xff] %v3727_v26  ;;  %1550 = vperm.xlu1 %2735, %v4562_v47  }
 0x1a2   :  { %1570 = vperm.xlu0 %2734, %v4504_v56   ;;  %v4567_v56 = vld [vmem:[#allocation10_spill] sm:$0xff] }
 0x1a3   :  { %v3731_v31 = vpop.permute.xlu1 %1174 }
 0x1a4   :  { %v3733_v46 = vpop.permute.xlu0 %1186 }
 0x1a5   :  { %4563 = vst [vmem:[#allocation5_spill] sm:$0xff] %v3733_v46  ;;  %1558 = vperm.xlu1 %2735, %v4564_v11  }
 0x1a6   :  { %1578 = vperm.xlu0 %2734, %v4508_v44   ;;  %v4568_v44 = vld [vmem:[#allocation12_spill] sm:$0xff] }
 0x1a7   :  { %v3737_v34 = vpop.permute.xlu1 %1182 }
 0x1a8   :  { %v3739_v48 = vpop.permute.xlu0 %1194 }
 0x1a9   :  { %4565 = vst [vmem:[#allocation6_spill] sm:$0xff] %v3739_v48  ;;  %1566 = vperm.xlu1 %2735, %v4566_v25  }
 0x1aa   :  { %1586 = vperm.xlu0 %2734, %v4512_v9  }
 0x1ab   :  { %v3743_v26 = vpop.permute.xlu1 %1190 }
 0x1ac   :  { %v3745_v47 = vpop.permute.xlu0 %1202 }
 0x1ad   :  { %1574 = vperm.xlu1 %2735, %v4567_v56  }
 0x1ae   :  { %1594 = vperm.xlu0 %2734, %v4515_v62  }
 0x1af   :  { %v3749_v46 = vpop.permute.xlu1 %1198 }
 0x1b0   :  { %v3751_v11 = vpop.permute.xlu0 %1210 }
 0x1b1   :  { %1582 = vperm.xlu1 %2735, %v4568_v44  }
 0x1b2   :  { %1602 = vperm.xlu0 %2734, %v4442_v54  }
 0x1b3   :  { %v3755_v48 = vpop.permute.xlu1 %1206 }
 0x1b4   :  { %v3757_v25 = vpop.permute.xlu0 %1218 }
 0x1b5   :  { %1590 = vperm.xlu1 %2735, %v4509_v60  }
 0x1b6   :  { %1610 = vperm.xlu0 %2734, %v4446_v20  }
 0x1b7   :  { %v3761_v9 = vpop.permute.xlu1 %1214 }
 0x1b8   :  { %v3763_v56 = vpop.permute.xlu0 %1226 }
 0x1b9   :  { %1598 = vperm.xlu1 %2735, %v4441_v13  }
 0x1ba   :  { %1618 = vperm.xlu0 %2734, %v4449_v55  }
 0x1bb   :  { %v3767_v62 = vpop.permute.xlu1 %1222 }
 0x1bc   :  { %v3769_v44 = vpop.permute.xlu0 %1234 }
 0x1bd   :  { %1606 = vperm.xlu1 %2735, %v4445_v50  }
 0x1be   :  { %1626 = vperm.xlu0 %2734, %v3129_v36  }
 0x1bf   :  { %v3773_v54 = vpop.permute.xlu1 %1230 }
 0x1c0   :  { %v3775_v60 = vpop.permute.xlu0 %1242 }
 0x1c1   :  { %1614 = vperm.xlu1 %2735, %v3083_v7  }
 0x1c2   :  { %1634 = vperm.xlu0 %2734, %v3139_v22  }
 0x1c3   :  { %v3779_v20 = vpop.permute.xlu1 %1238 }
 0x1c4   :  { %v3781_v13 = vpop.permute.xlu0 %1250 }
 0x1c5   :  { %1622 = vperm.xlu1 %2735, %v3131_v15  }
 0x1c6   :  { %1642 = vperm.xlu0 %2734, %v3177_v1  }
 0x1c7   :  { %v3785_v55 = vpop.permute.xlu1 %1246 }
 0x1c8   :  { %v3787_v50 = vpop.permute.xlu0 %1258 }
 0x1c9   :  { %1630 = vperm.xlu1 %2735, %v3141_v61  }
 0x1ca   :  { %1650 = vperm.xlu0 %2734, %v3184_v23  }
 0x1cb   :  { %v3791_v36 = vpop.permute.xlu1 %1254 }
 0x1cc   :  { %v3793_v7 = vpop.permute.xlu0 %1266 }
 0x1cd   :  { %1638 = vperm.xlu1 %2735, %v3180_v49  }
 0x1ce   :  { %1658 = vperm.xlu0 %2734, %v3192_v8  }
 0x1cf   :  { %v3797_v22 = vpop.permute.xlu1 %1262 }
 0x1d0   :  { %v3799_v15 = vpop.permute.xlu0 %1274 }
 0x1d1   :  { %1646 = vperm.xlu1 %2735, %v3188_v18  }
 0x1d2   :  { %1666 = vperm.xlu0 %2734, %v3200_v32  }
 0x1d3   :  { %v3803_v1 = vpop.permute.xlu1 %1270 }
 0x1d4   :  { %v3805_v61 = vpop.permute.xlu0 %1282 }
 0x1d5   :  { %1654 = vperm.xlu1 %2735, %v3196_v16  }
 0x1d6   :  { %1674 = vperm.xlu0 %2734, %v3208_v37  }
 0x1d7   :  { %v3809_v23 = vpop.permute.xlu1 %1278 }
 0x1d8   :  { %v3811_v49 = vpop.permute.xlu0 %1290 }
 0x1d9   :  { %1662 = vperm.xlu1 %2735, %v3204_v33  }
 0x1da   :  { %1682 = vperm.xlu0 %2734, %v3216_v40  }
 0x1db   :  { %v3815_v8 = vpop.permute.xlu1 %1286 }
 0x1dc   :  { %v3817_v18 = vpop.permute.xlu0 %1298 }
 0x1dd   :  { %4569 = vst [vmem:[#allocation8_spill] sm:$0xff] %v3817_v18  ;;  %1670 = vperm.xlu1 %2735, %v3212_v38  }
 0x1de   :  { %1690 = vperm.xlu0 %2734, %v3224_v52  }
 0x1df   :  { %v3821_v32 = vpop.permute.xlu1 %1294 }
 0x1e0   :  { %v3823_v16 = vpop.permute.xlu0 %1306 }
 0x1e1   :  { %4570 = vst [vmem:[#allocation10_spill] sm:$0xff] %v3823_v16  ;;  %1678 = vperm.xlu1 %2735, %v3220_v41  }
 0x1e2   :  { %1698 = vperm.xlu0 %2734, %v3232_v28  }
 0x1e3   :  { %v3827_v37 = vpop.permute.xlu1 %1302 }
 0x1e4   :  { %4571 = vst [vmem:[#allocation12_spill] sm:$0xff] %v3827_v37  ;;  %v3829_v33 = vpop.permute.xlu0 %1314 }
 0x1e5   :  { %4572 = vst [vmem:[#allocation143_spill] sm:$0xff] %v3829_v33  ;;  %1686 = vperm.xlu1 %2735, %v3228_v53  }
 0x1e6   :  { %1706 = vperm.xlu0 %2734, %v3240_v42  }
 0x1e7   :  { %v3833_v40 = vpop.permute.xlu1 %1310 }
 0x1e8   :  { %4573 = vst [vmem:[#allocation144_spill] sm:$0xff] %v3833_v40  ;;  %v3835_v38 = vpop.permute.xlu0 %1322 }
 0x1e9   :  { %4574 = vst [vmem:[#allocation145_spill] sm:$0xff] %v3835_v38  ;;  %1694 = vperm.xlu1 %2735, %v3236_v30  }
 0x1ea   :  { %1714 = vperm.xlu0 %2734, %v3248_v63  }
 0x1eb   :  { %v3839_v52 = vpop.permute.xlu1 %1318 }
 0x1ec   :  { %4575 = vst [vmem:[#allocation146_spill] sm:$0xff] %v3839_v52  ;;  %v3841_v41 = vpop.permute.xlu0 %1330 }
 0x1ed   :  { %4576 = vst [vmem:[#allocation147_spill] sm:$0xff] %v3841_v41  ;;  %1702 = vperm.xlu1 %2735, %v3244_v58   ;;  %v4595_v41 = vld [vmem:[#allocation24_spill] sm:$0xff] }
 0x1ee   :  { %1722 = vperm.xlu0 %2734, %v3256_v3  }
 0x1ef   :  { %v3845_v28 = vpop.permute.xlu1 %1326 }
 0x1f0   :  { %4577 = vst [vmem:[#allocation148_spill] sm:$0xff] %v3845_v28  ;;  %v3847_v53 = vpop.permute.xlu0 %1338  ;;  %v4598_v28 = vld [vmem:[#allocation85_spill] sm:$0xff] }
 0x1f1   :  { %4578 = vst [vmem:[#allocation149_spill] sm:$0xff] %v3847_v53  ;;  %1710 = vperm.xlu1 %2735, %v3252_v14   ;;  %v4593_v53 = vld [vmem:[#allocation83_spill] sm:$0xff] }
 0x1f2   :  { %1730 = vperm.xlu0 %2734, %v3264_v4   ;;  %v673_v4 = vlaneseq }
 0x1f3   :  { %v3851_v42 = vpop.permute.xlu1 %1334 }
 0x1f4   :  { %4579 = vst [vmem:[#allocation150_spill] sm:$0xff] %v3851_v42  ;;  %v3853_v30 = vpop.permute.xlu0 %1346 }
 0x1f5   :  { %4580 = vst [vmem:[#allocation151_spill] sm:$0xff] %v3853_v30  ;;  %1718 = vperm.xlu1 %2735, %v3260_v19   ;;  %v674_v30 = vshrl.u32 %v673_v4, 7 }
 0x1f6   :  { %1738 = vperm.xlu0 %2734, %v3272_v24  }
 0x1f7   :  { %v3857_v63 = vpop.permute.xlu1 %1342 }
 0x1f8   :  { %4581 = vst [vmem:[#allocation152_spill] sm:$0xff] %v3857_v63  ;;  %v3859_v58 = vpop.permute.xlu0 %1354  ;;  %v4587_v63 = vld [vmem:[#allocation20_spill] sm:$0xff] }
 0x1f9   :  { %4582 = vst [vmem:[#allocation153_spill] sm:$0xff] %v3859_v58  ;;  %1726 = vperm.xlu1 %2735, %v3268_v5   ;;  %v999_v5 = vsub.s32 1, %v674_v30 }
 0x1fa   :  { %1746 = vperm.xlu0 %2734, %v3280_v6  }
 0x1fb   :  { %v3863_v3 = vpop.permute.xlu1 %1350 }
 0x1fc   :  { %4583 = vst [vmem:[#allocation154_spill] sm:$0xff] %v3863_v3  ;;  %v3865_v14 = vpop.permute.xlu0 %1362 }
 0x1fd   :  { %4584 = vst [vmem:[#allocation155_spill] sm:$0xff] %v3865_v14  ;;  %1734 = vperm.xlu1 %2735, %v3276_v0   ;;  %v1387_v14 = vsub.s32 2, %v674_v30  ;;  %v352_v0 = vld [vmem:[%s4361_s3] sm:$0xf]  ;;  %s2764_s3 = smov [#allocation2]  }
 0x1fe   :  { %1754 = vperm.xlu0 %2734, %v4556_v35   ;;  %v675_v35 = vsub.s32 0, %v674_v30  ;;  %v3884_v4 = vrot.slane %v352_v0, %v999_v5  ;;  %s2230_s26 = sshll.u32 %s2764_s3, 4  ;;  %s2231_s26 = int_to_ptr.vmem [resolvable:$true] %s2230_s26 }
 0x1ff   :  { %v3869_v19 = vpop.permute.xlu1 %1358  ;;  %s2736_s27 = scalar_lea.vmem %s2231_s26, 4096  ;;  %p2741_p1 = scmp.lt.s32.totalorder %s2231_s26, %s2231_s26 }
 0x200   :  { %4585 = vst [vmem:[#allocation156_spill] sm:$0xff] %v3869_v19  ;;  %v3871_v24 = vpop.permute.xlu0 %1370  ;;  %v4591_v19 = vld [vmem:[#allocation22_spill] sm:$0xff]  ;;  %v1001_v42 = vmul.f32 %v3884_v4, %v4593_v53  ;;  %v4597_v53 = vld [vmem:[#allocation84_spill] sm:$0xff]  ;;  %p2737_p0 = scmp.ne.s32.totalorder %s2231_s26, %s2736_s27  ;;  %p2742_p2 = scmp.lt.s32.totalorder %s2736_s27, %s2736_s27 }
 0x201   :  { %4586 = vst [vmem:[#allocation157_spill] sm:$0xff] %v3871_v24  ;;  %1742 = vperm.xlu1 %2735, %v4587_v63   ;;  %v3888_v24 = vrot.slane %v352_v0, %v1387_v14  ;;  %v4596_v14 = vld [vmem:[#allocation26_spill] sm:$0xff] }
 0x202   :  { %1762 = vperm.xlu0 %2734, %v3295_v10   ;;  %v1775_v10 = vsub.s32 3, %v674_v30  ;;  %p2743_p3 = por %p2742_p2, %p2741_p1 }
 0x203   :  { %v3875_v6 = vpop.permute.xlu1 %1366 }
 0x204   :  { %4588 = vst [vmem:[#allocation20_spill] sm:$0xff] %v3875_v6  ;;  %v3877_v58 = vpop.permute.xlu0 %1378  ;;  %p2744_p4 = pnand %p2743_p3, %p2737_p0 }
 0x205   :  { %4589 = vst [vmem:[#allocation158_spill] sm:$0xff] %v3877_v58  ;;  %1750 = vperm.xlu1 %2735, %v3291_v57   ;;  %v3891_v58 = vrot.slane %v352_v0, %v675_v35  ;;  %v4592_v57 = vld [vmem:[#allocation82_spill] sm:$0xff]  ;;  %v1390_v35 = vmul.f32 %v3888_v24, %v3697_v2  ;;  %v1391_v2 = vmul.f32 %v3888_v24, %v3701_v17 }
 0x206   :  { %1770 = vperm.xlu0 %2734, %v3303_v51   ;;  %v1002_v3 = vmul.f32 %v3884_v4, %v4592_v57  ;;  %v3897_v51 = vrot.slane %v352_v0, %v1775_v10  ;;  %v1003_v0 = vmul.f32 %v3884_v4, %v4597_v53  ;;  %v4602_v53 = vld [vmem:[#allocation87_spill] sm:$0xff] }
 0x207   :  { %v3886_v63 = vpop.permute.xlu1 %1374  ;;  %v677_v30 = vmul.f32 %v3891_v58, %v4595_v41  ;;  %v1004_v41 = vmul.f32 %v3884_v4, %v4598_v28 }
 0x208   :  { %4590 = vst [vmem:[#allocation159_spill] sm:$0xff] %v3886_v63  ;;  %v678_v63 = vmul.f32 %v3891_v58, %v4596_v14  ;;  %v4599_v14 = vld [vmem:[#allocation23_spill] sm:$0xff] }
 0x209   :  { %v1519_v6 = vpop.permute.xlu0 %1518  ;;  %1758 = vperm.xlu1 %2735, %v4591_v19   ;;  %v1389_v19 = vmul.f32 %v3888_v24, %v3695_v45  ;;  %v679_v52 = vmul.f32 %v3891_v58, %v4599_v14  ;;  %v4600_v45 = vld [vmem:[#allocation25_spill] sm:$0xff]  ;;  %v1006_v14 = vmul.f32 %v3884_v4, %v4602_v53 }
 0x20a   :  { %v1066_v10 = vadd.f32 %v1002_v3, %v678_v63  ;;  %v1777_v38 = vmul.f32 %v3897_v51, %v1519_v6  ;;  %v680_v33 = vmul.f32 %v3891_v58, %v4600_v45  ;;  %v4601_v6 = vld [vmem:[#allocation86_spill] sm:$0xff]  ;;  %v4606_v53 = vld [vmem:[#allocation89_spill] sm:$0xff] }
 0x20b   :  { %v3899_v5 = vpop.permute.xlu1 %1382  ;;  %v1067_v63 = vadd.f32 %v1003_v0, %v679_v52  ;;  %v1393_v52 = vmul.f32 %v3888_v24, %v3703_v12 }
 0x20c   :  { %4594 = vst [vmem:[#allocation22_spill] sm:$0xff] %v3899_v5  ;;  %v1065_v5 = vadd.f32 %v1001_v42, %v677_v30  ;;  %v1454_v16 = vadd.f32 %v1390_v35, %v1066_v10  ;;  %v1392_v42 = vmul.f32 %v3888_v24, %v3707_v43  ;;  %v1005_v30 = vmul.f32 %v3884_v4, %v4601_v6  ;;  %v4604_v35 = vld [vmem:[#allocation28_spill] sm:$0xff] }
 0x20d   :  { %v1531_v57 = vpop.permute.xlu0 %1530  ;;  %1766 = vperm.xlu1 %2735, %v3307_v21   ;;  %v1068_v45 = vadd.f32 %v1004_v41, %v680_v33  ;;  %v681_v43 = vmul.f32 %v3891_v58, %v4604_v35  ;;  %v1455_v10 = vadd.f32 %v1391_v2, %v1067_v63  ;;  %v1394_v6 = vmul.f32 %v3888_v24, %v3713_v59  ;;  %v4605_v41 = vld [vmem:[#allocation88_spill] sm:$0xff] }
 0x20e   :  { %v1453_v40 = vadd.f32 %v1389_v19, %v1065_v5  ;;  %v1780_v17 = vmul.f32 %v3897_v51, %v1531_v57  ;;  %v4603_v5 = vld [vmem:[#allocation27_spill] sm:$0xff]  ;;  %v1008_v2 = vmul.f32 %v3884_v4, %v4606_v53  ;;  %v1396_v35 = vmul.f32 %v3888_v24, %v3719_v27 }
 0x20f   :  { %v682_v19 = vmul.f32 %v3891_v58, %v4603_v5 }
 0x210   :  { %v1523_v21 = vpop.permute.xlu1 %1522  ;;  %v1841_v37 = vadd.f32 %v1777_v38, %v1453_v40 }
 0x211   :  { %v1778_v3 = vmul.f32 %v3897_v51, %v1523_v21  ;;  %v1539_v28 = vpop.permute.xlu0 %1538  ;;  %v1456_v21 = vadd.f32 %v1392_v42, %v1068_v45  ;;  %v1070_v57 = vadd.f32 %v1006_v14, %v682_v19  ;;  %v4607_v45 = vld [vmem:[#allocation29_spill] sm:$0xff] }
 0x212   :  { %v1782_v12 = vmul.f32 %v3897_v51, %v1539_v28  ;;  %v684_v59 = vmul.f32 %v3891_v58, %v4607_v45 }
 0x213   :  { %v1842_v18 = vadd.f32 %v1778_v3, %v1454_v16  ;;  %v1069_v16 = vadd.f32 %v1005_v30, %v681_v43  ;;  %v1007_v3 = vmul.f32 %v3884_v4, %v4605_v41  ;;  %v1844_v63 = vadd.f32 %v1780_v17, %v1456_v21  ;;  %v4612_v41 = vld [vmem:[#allocation32_spill] sm:$0xff] }
 0x214   :  { %v1527_v0 = vpop.permute.xlu1 %1526  ;;  %v1395_v30 = vmul.f32 %v3888_v24, %v3709_v29  ;;  %v1458_v19 = vadd.f32 %v1394_v6, %v1070_v57  ;;  %v4611_v57 = vld [vmem:[#allocation31_spill] sm:$0xff]  ;;  %v685_v53 = vmul.f32 %v3891_v58, %v4612_v41 }
 0x215   :  { %v2502_v33 = vpack.c.bf16 %v1842_v18, %v1841_v37  ;;  %v1779_v40 = vmul.f32 %v3897_v51, %v1527_v0  ;;  %v1547_v38 = vpop.permute.xlu0 %1546  ;;  %v4608_v18 = vld [vmem:[#allocation30_spill] sm:$0xff]  ;;  %v1457_v5 = vadd.f32 %v1393_v52, %v1069_v16  ;;  %v1072_v52 = vadd.f32 %v1008_v2, %v684_v59 }
 0x216   :  { %v683_v37 = vmul.f32 %v3891_v58, %v4608_v18  ;;  %v4609_v0 = vld [vmem:[#allocation90_spill] sm:$0xff]  ;;  %v1846_v16 = vadd.f32 %v1782_v12, %v1458_v19  ;;  %v1784_v29 = vmul.f32 %v3897_v51, %v1547_v38  ;;  %v686_v27 = vmul.f32 %v3891_v58, %v4611_v57 }
 0x217   :  { %2503 = vst [vmem:[#allocation2] sm:$0xff] %v2502_v33   ;;  %v1843_v42 = vadd.f32 %v1779_v40, %v1455_v10  ;;  %v1009_v21 = vmul.f32 %v3884_v4, %v4609_v0  ;;  %v4610_v33 = vld [vmem:[#allocation91_spill] sm:$0xff]  ;;  %v1460_v18 = vadd.f32 %v1396_v35, %v1072_v52  ;;  %v1398_v2 = vmul.f32 %v3888_v24, %v3725_v39  ;;  %v4616_v0 = vld [vmem:[#allocation33_spill] sm:$0xff] }
 0x218   :  { %v1535_v14 = vpop.permute.xlu1 %1534  ;;  %v1071_v10 = vadd.f32 %v1007_v3, %v683_v37  ;;  %v1010_v40 = vmul.f32 %v3884_v4, %v4610_v33  ;;  %v4613_v3 = vld [vmem:[#allocation140_spill] sm:$0xff]  ;;  %v688_v39 = vmul.f32 %v3891_v58, %v4616_v0  ;;  %v4617_v33 = vld [vmem:[#allocation34_spill] sm:$0xff] }
 0x219   :  { %v2507_v17 = vpack.c.bf16 %v1844_v63, %v1843_v42  ;;  %v1781_v43 = vmul.f32 %v3897_v51, %v1535_v14  ;;  %v1555_v28 = vpop.permute.xlu0 %1554  ;;  %v1397_v42 = vmul.f32 %v3888_v24, %v4613_v3  ;;  %v1073_v37 = vadd.f32 %v1009_v21, %v685_v53  ;;  %v4614_v14 = vld [vmem:[#allocation92_spill] sm:$0xff]  ;;  %v4618_v21 = vld [vmem:[#allocation141_spill] sm:$0xff] }
 0x21a   :  { %v1459_v63 = vadd.f32 %v1395_v30, %v1071_v10  ;;  %v1011_v19 = vmul.f32 %v3884_v4, %v4614_v14  ;;  %v1786_v10 = vmul.f32 %v3897_v51, %v1555_v28  ;;  %v687_v52 = vmul.f32 %v3891_v58, %v4617_v33 }
 0x21b   :  { %2690 = vst [vmem:[#allocation2 + $0x8] sm:$0xff] %v2507_v17   ;;  %v1845_v6 = vadd.f32 %v1781_v43, %v1457_v5  ;;  %v1074_v5 = vadd.f32 %v1010_v40, %v686_v27  ;;  %v4615_v17 = vld [vmem:[#allocation93_spill] sm:$0xff]  ;;  %v1848_v43 = vadd.f32 %v1784_v29, %v1460_v18  ;;  %v1399_v40 = vmul.f32 %v3888_v24, %v4618_v21 }
 0x21c   :  { %v1543_v45 = vpop.permute.xlu1 %1542  ;;  %v1012_v30 = vmul.f32 %v3884_v4, %v4615_v17  ;;  %v1400_v27 = vmul.f32 %v3888_v24, %v3731_v31  ;;  %v1075_v53 = vadd.f32 %v1011_v19, %v687_v52  ;;  %v4623_v19 = vld [vmem:[#allocation142_spill] sm:$0xff] }
 0x21d   :  { %v2512_v12 = vpack.c.bf16 %v1846_v16, %v1845_v6  ;;  %v1783_v59 = vmul.f32 %v3897_v51, %v1543_v45  ;;  %v1563_v38 = vpop.permute.xlu0 %1562  ;;  %v1461_v16 = vadd.f32 %v1397_v42, %v1073_v37  ;;  %v1462_v57 = vadd.f32 %v1398_v2, %v1074_v5  ;;  %v4620_v45 = vld [vmem:[#allocation95_spill] sm:$0xff]  ;;  %v4622_v5 = vld [vmem:[#allocation36_spill] sm:$0xff] }
 0x21e   :  { %v1014_v18 = vmul.f32 %v3884_v4, %v4620_v45  ;;  %v1076_v42 = vadd.f32 %v1012_v30, %v688_v39  ;;  %v4621_v37 = vld [vmem:[#allocation35_spill] sm:$0xff]  ;;  %v689_v14 = vmul.f32 %v3891_v58, %v4622_v5  ;;  %v1463_v17 = vadd.f32 %v1399_v40, %v1075_v53  ;;  %v4627_v53 = vld [vmem:[#allocation38_spill] sm:$0xff] }
 0x21f   :  { %2691 = vst [vmem:[#allocation2 + $0x10] sm:$0xff] %v2512_v12   ;;  %v1847_v35 = vadd.f32 %v1783_v59, %v1459_v63  ;;  %v4619_v63 = vld [vmem:[#allocation94_spill] sm:$0xff]  ;;  %v1850_v12 = vadd.f32 %v1786_v10, %v1462_v57  ;;  %v1788_v59 = vmul.f32 %v3897_v51, %v1563_v38  ;;  %v690_v31 = vmul.f32 %v3891_v58, %v4621_v37  ;;  %v4629_v5 = vld [vmem:[#allocation7_spill] sm:$0xff] }
 0x220   :  { %v1551_v6 = vpop.permute.xlu1 %1550  ;;  %v1013_v3 = vmul.f32 %v3884_v4, %v4619_v63  ;;  %v1464_v0 = vadd.f32 %v1400_v27, %v1076_v42  ;;  %v1402_v30 = vmul.f32 %v3888_v24, %v3737_v34  ;;  %v691_v63 = vmul.f32 %v3891_v58, %v4627_v53  ;;  %v4634_v53 = vld [vmem:[#allocation9_spill] sm:$0xff] }
 0x221   :  { %v2517_v29 = vpack.c.bf16 %v1848_v43, %v1847_v35  ;;  %v1785_v41 = vmul.f32 %v3897_v51, %v1551_v6  ;;  %v1571_v28 = vpop.permute.xlu0 %1570  ;;  %v1401_v43 = vmul.f32 %v3888_v24, %v4623_v19  ;;  %v1078_v52 = vadd.f32 %v1014_v18, %v690_v31  ;;  %v4625_v6 = vld [vmem:[#allocation97_spill] sm:$0xff] }
 0x222   :  { %v1077_v33 = vadd.f32 %v1013_v3, %v689_v14  ;;  %v1016_v40 = vmul.f32 %v3884_v4, %v4625_v6  ;;  %v1852_v57 = vadd.f32 %v1788_v59, %v1464_v0  ;;  %v4628_v3 = vld [vmem:[#allocation5_spill] sm:$0xff]  ;;  %v1017_v14 = vmul.f32 %v3884_v4, %v4629_v5 }
 0x223   :  { %2692 = vst [vmem:[#allocation2 + $0x18] sm:$0xff] %v2517_v29   ;;  %v1849_v2 = vadd.f32 %v1785_v41, %v1461_v16  ;;  %v4624_v16 = vld [vmem:[#allocation96_spill] sm:$0xff]  ;;  %v1790_v29 = vmul.f32 %v3897_v51, %v1571_v28  ;;  %v4626_v41 = vld [vmem:[#allocation37_spill] sm:$0xff]  ;;  %v1403_v18 = vmul.f32 %v3888_v24, %v4628_v3  ;;  %v1407_v5 = vmul.f32 %v3888_v24, %v3745_v47 }
 0x224   :  { %v1559_v35 = vpop.permute.xlu1 %1558  ;;  %v1015_v21 = vmul.f32 %v3884_v4, %v4624_v16  ;;  %v692_v34 = vmul.f32 %v3891_v58, %v4626_v41  ;;  %v1465_v45 = vadd.f32 %v1401_v43, %v1077_v33  ;;  %v4633_v16 = vld [vmem:[#allocation6_spill] sm:$0xff] }
 0x225   :  { %v2522_v10 = vpack.c.bf16 %v1850_v12, %v1849_v2  ;;  %v1787_v39 = vmul.f32 %v3897_v51, %v1559_v35  ;;  %v1579_v38 = vpop.permute.xlu0 %1578  ;;  %v1466_v12 = vadd.f32 %v1402_v30, %v1078_v52  ;;  %v1404_v2 = vmul.f32 %v3888_v24, %v3743_v26 }
 0x226   :  { %v1079_v31 = vadd.f32 %v1015_v21, %v691_v63  ;;  %v1080_v43 = vadd.f32 %v1016_v40, %v692_v34  ;;  %v1792_v0 = vmul.f32 %v3897_v51, %v1579_v38  ;;  %v1405_v21 = vmul.f32 %v3888_v24, %v4633_v16 }
 0x227   :  { %2693 = vst [vmem:[#allocation2 + $0x20] sm:$0xff] %v2522_v10   ;;  %v1851_v27 = vadd.f32 %v1787_v39, %v1463_v17  ;;  %v4630_v17 = vld [vmem:[#allocation98_spill] sm:$0xff]  ;;  %v1854_v35 = vadd.f32 %v1790_v29, %v1466_v12  ;;  %v4631_v10 = vld [vmem:[#allocation39_spill] sm:$0xff]  ;;  %v4632_v39 = vld [vmem:[#allocation40_spill] sm:$0xff]  ;;  %v1406_v40 = vmul.f32 %v3888_v24, %v3749_v46  ;;  %v1019_v63 = vmul.f32 %v3884_v4, %v4634_v53 }
 0x228   :  { %v1567_v42 = vpop.permute.xlu1 %1566  ;;  %v1018_v19 = vmul.f32 %v3884_v4, %v4630_v17  ;;  %v694_v26 = vmul.f32 %v3891_v58, %v4631_v10  ;;  %v693_v33 = vmul.f32 %v3891_v58, %v4632_v39  ;;  %v1467_v52 = vadd.f32 %v1403_v18, %v1079_v31 }
 0x229   :  { %v2527_v59 = vpack.c.bf16 %v1852_v57, %v1851_v27  ;;  %v1789_v37 = vmul.f32 %v3897_v51, %v1567_v42  ;;  %v1587_v28 = vpop.permute.xlu0 %1586  ;;  %v1468_v57 = vadd.f32 %v1404_v2, %v1080_v43  ;;  %v4636_v2 = vld [vmem:[#allocation41_spill] sm:$0xff] }
 0x22a   :  { %v1081_v41 = vadd.f32 %v1017_v14, %v693_v33  ;;  %v1082_v34 = vadd.f32 %v1018_v19, %v694_v26  ;;  %v1794_v42 = vmul.f32 %v3897_v51, %v1587_v28  ;;  %v696_v46 = vmul.f32 %v3891_v58, %v4636_v2  ;;  %v4639_v26 = vld [vmem:[#allocation99_spill] sm:$0xff] }
 0x22b   :  { %2694 = vst [vmem:[#allocation2 + $0x28] sm:$0xff] %v2527_v59   ;;  %v1853_v30 = vadd.f32 %v1789_v37, %v1465_v45  ;;  %v4635_v45 = vld [vmem:[#allocation14_spill] sm:$0xff]  ;;  %v1856_v18 = vadd.f32 %v1792_v0, %v1468_v57  ;;  %v1408_v19 = vmul.f32 %v3888_v24, %v3755_v48  ;;  %v1022_v39 = vmul.f32 %v3884_v4, %v4639_v26  ;;  %v4646_v26 = vld [vmem:[#allocation101_spill] sm:$0xff] }
 0x22c   :  { %v1575_v6 = vpop.permute.xlu1 %1574  ;;  %v1020_v3 = vmul.f32 %v3884_v4, %v4635_v45  ;;  %v4637_v59 = vld [vmem:[#allocation42_spill] sm:$0xff]  ;;  %v1469_v31 = vadd.f32 %v1405_v21, %v1081_v41  ;;  %v1470_v17 = vadd.f32 %v1406_v40, %v1082_v34  ;;  %v4640_v21 = vld [vmem:[#allocation43_spill] sm:$0xff]  ;;  %v1410_v34 = vmul.f32 %v3888_v24, %v3761_v9 }
 0x22d   :  { %v2532_v29 = vpack.c.bf16 %v1854_v35, %v1853_v30  ;;  %v1791_v27 = vmul.f32 %v3897_v51, %v1575_v6  ;;  %v1595_v38 = vpop.permute.xlu0 %1594  ;;  %v695_v37 = vmul.f32 %v3891_v58, %v4637_v59  ;;  %v4638_v30 = vld [vmem:[#allocation11_spill] sm:$0xff]  ;;  %v698_v48 = vmul.f32 %v3891_v58, %v4640_v21  ;;  %v4641_v6 = vld [vmem:[#allocation44_spill] sm:$0xff] }
 0x22e   :  { %v1021_v10 = vmul.f32 %v3884_v4, %v4638_v30  ;;  %v1084_v33 = vadd.f32 %v1020_v3, %v696_v46  ;;  %v1796_v47 = vmul.f32 %v3897_v51, %v1595_v38  ;;  %v697_v57 = vmul.f32 %v3891_v58, %v4641_v6  ;;  %v4649_v6 = vld [vmem:[#allocation17_spill] sm:$0xff] }
 0x22f   :  { %2695 = vst [vmem:[#allocation2 + $0x30] sm:$0xff] %v2532_v29   ;;  %v1855_v12 = vadd.f32 %v1791_v27, %v1467_v52  ;;  %v1083_v0 = vadd.f32 %v1019_v63, %v695_v37  ;;  %v1858_v52 = vadd.f32 %v1794_v42, %v1470_v17  ;;  %v1409_v29 = vmul.f32 %v3888_v24, %v3751_v11  ;;  %v4644_v37 = vld [vmem:[#allocation16_spill] sm:$0xff] }
 0x230   :  { %v1583_v14 = vpop.permute.xlu1 %1582  ;;  %v1472_v41 = vadd.f32 %v1408_v19, %v1084_v33  ;;  %v1085_v45 = vadd.f32 %v1021_v10, %v697_v57  ;;  %v1086_v3 = vadd.f32 %v1022_v39, %v698_v48  ;;  %v700_v9 = vmul.f32 %v3891_v58, %v4644_v37  ;;  %v4647_v33 = vld [vmem:[#allocation102_spill] sm:$0xff]  ;;  %v4653_v37 = vld [vmem:[#allocation45_spill] sm:$0xff] }
 0x231   :  { %v2537_v43 = vpack.c.bf16 %v1856_v18, %v1855_v12  ;;  %v1793_v35 = vmul.f32 %v3897_v51, %v1583_v14  ;;  %v1603_v28 = vpop.permute.xlu0 %1602  ;;  %v1471_v40 = vadd.f32 %v1407_v5, %v1083_v0  ;;  %v4642_v18 = vld [vmem:[#allocation13_spill] sm:$0xff]  ;;  %v4643_v12 = vld [vmem:[#allocation100_spill] sm:$0xff]  ;;  %v1411_v17 = vmul.f32 %v3888_v24, %v3757_v25  ;;  %v4648_v48 = vld [vmem:[#allocation18_spill] sm:$0xff] }
 0x232   :  { %v1023_v42 = vmul.f32 %v3884_v4, %v4642_v18  ;;  %v1024_v2 = vmul.f32 %v3884_v4, %v4643_v12  ;;  %v1860_v46 = vadd.f32 %v1796_v47, %v1472_v41  ;;  %v1798_v11 = vmul.f32 %v3897_v51, %v1603_v28  ;;  %v4650_v18 = vld [vmem:[#allocation103_spill] sm:$0xff]  ;;  %v4651_v12 = vld [vmem:[#allocation104_spill] sm:$0xff] }
 0x233   :  { %2696 = vst [vmem:[#allocation2 + $0x38] sm:$0xff] %v2537_v43   ;;  %v1857_v16 = vadd.f32 %v1793_v35, %v1469_v31  ;;  %v4645_v31 = vld [vmem:[#allocation15_spill] sm:$0xff]  ;;  %v1473_v14 = vadd.f32 %v1409_v29, %v1085_v45  ;;  %v1474_v43 = vadd.f32 %v1410_v34, %v1086_v3  ;;  %v1412_v35 = vmul.f32 %v3888_v24, %v3767_v62 }
 0x234   :  { %v1591_v27 = vpop.permute.xlu1 %1590  ;;  %v699_v5 = vmul.f32 %v3891_v58, %v4645_v31  ;;  %v1025_v39 = vmul.f32 %v3884_v4, %v4646_v26  ;;  %v1088_v47 = vadd.f32 %v1024_v2, %v700_v9  ;;  %v702_v62 = vmul.f32 %v3891_v58, %v4648_v48  ;;  %v4655_v26 = vld [vmem:[#allocation106_spill] sm:$0xff] }
 0x235   :  { %v2542_v53 = vpack.c.bf16 %v1858_v52, %v1857_v16  ;;  %v1795_v63 = vmul.f32 %v3897_v51, %v1591_v27  ;;  %v1611_v38 = vpop.permute.xlu0 %1610  ;;  %v1026_v52 = vmul.f32 %v3884_v4, %v4647_v33  ;;  %v1862_v16 = vadd.f32 %v1798_v11, %v1474_v43 }
 0x236   :  { %v1087_v10 = vadd.f32 %v1023_v42, %v699_v5  ;;  %v1800_v25 = vmul.f32 %v3897_v51, %v1611_v38  ;;  %v701_v57 = vmul.f32 %v3891_v58, %v4649_v6  ;;  %v1413_v29 = vmul.f32 %v3888_v24, %v3763_v56 }
 0x237   :  { %2697 = vst [vmem:[#allocation2 + $0x40] sm:$0xff] %v2542_v53   ;;  %v1859_v59 = vadd.f32 %v1795_v63, %v1471_v40  ;;  %v1476_v41 = vadd.f32 %v1412_v35, %v1088_v47  ;;  %v1414_v34 = vmul.f32 %v3888_v24, %v3773_v54  ;;  %v1090_v3 = vadd.f32 %v1026_v52, %v702_v62 }
 0x238   :  { %v1599_v19 = vpop.permute.xlu1 %1598  ;;  %v1475_v40 = vadd.f32 %v1411_v17, %v1087_v10  ;;  %v1089_v45 = vadd.f32 %v1025_v39, %v701_v57  ;;  %v1027_v42 = vmul.f32 %v3884_v4, %v4650_v18  ;;  %v1028_v2 = vmul.f32 %v3884_v4, %v4651_v12  ;;  %v4660_v12 = vld [vmem:[#allocation48_spill] sm:$0xff] }
 0x239   :  { %v2547_v0 = vpack.c.bf16 %v1860_v46, %v1859_v59  ;;  %v1797_v30 = vmul.f32 %v3897_v51, %v1599_v19  ;;  %v1619_v28 = vpop.permute.xlu0 %1618  ;;  %v1864_v46 = vadd.f32 %v1800_v25, %v1476_v41  ;;  %v4652_v59 = vld [vmem:[#allocation19_spill] sm:$0xff]  ;;  %v703_v9 = vmul.f32 %v3891_v58, %v4653_v37 }
 0x23a   :  { %v1802_v56 = vmul.f32 %v3897_v51, %v1619_v28  ;;  %v704_v54 = vmul.f32 %v3891_v58, %v4652_v59  ;;  %v1477_v31 = vadd.f32 %v1413_v29, %v1089_v45  ;;  %v1415_v5 = vmul.f32 %v3888_v24, %v3769_v44  ;;  %v4654_v28 = vld [vmem:[#allocation105_spill] sm:$0xff]  ;;  %v4657_v25 = vld [vmem:[#allocation47_spill] sm:$0xff]  ;;  %v4659_v45 = vld [vmem:[#allocation108_spill] sm:$0xff] }
 0x23b   :  { %2698 = vst [vmem:[#allocation2 + $0x48] sm:$0xff] %v2547_v0   ;;  %v1861_v21 = vadd.f32 %v1797_v30, %v1473_v14  ;;  %v1478_v17 = vadd.f32 %v1414_v34, %v1090_v3  ;;  %v1416_v19 = vmul.f32 %v3888_v24, %v3779_v20  ;;  %v1091_v30 = vadd.f32 %v1027_v42, %v703_v9 }
 0x23c   :  { %v1607_v27 = vpop.permute.xlu1 %1606  ;;  %v1029_v10 = vmul.f32 %v3884_v4, %v4654_v28  ;;  %v1030_v39 = vmul.f32 %v3884_v4, %v4655_v26  ;;  %v1092_v33 = vadd.f32 %v1028_v2, %v704_v54  ;;  %v1417_v62 = vmul.f32 %v3888_v24, %v3775_v60  ;;  %v4661_v2 = vld [vmem:[#allocation49_spill] sm:$0xff]  ;;  %v4665_v26 = vld [vmem:[#allocation51_spill] sm:$0xff] }
 0x23d   :  { %v2552_v53 = vpack.c.bf16 %v1862_v16, %v1861_v21  ;;  %v1799_v63 = vmul.f32 %v3897_v51, %v1607_v27  ;;  %v1627_v38 = vpop.permute.xlu0 %1626  ;;  %v1866_v52 = vadd.f32 %v1802_v56, %v1478_v17  ;;  %v4656_v16 = vld [vmem:[#allocation46_spill] sm:$0xff]  ;;  %v705_v21 = vmul.f32 %v3891_v58, %v4657_v25  ;;  %v4662_v17 = vld [vmem:[#allocation109_spill] sm:$0xff] }
 0x23e   :  { %v1804_v44 = vmul.f32 %v3897_v51, %v1627_v38  ;;  %v706_v20 = vmul.f32 %v3891_v58, %v4656_v16  ;;  %v1479_v48 = vadd.f32 %v1415_v5, %v1091_v30  ;;  %v1480_v57 = vadd.f32 %v1416_v19, %v1092_v33 }
 0x23f   :  { %2699 = vst [vmem:[#allocation2 + $0x50] sm:$0xff] %v2552_v53   ;;  %v1863_v11 = vadd.f32 %v1799_v63, %v1475_v40  ;;  %v1418_v40 = vmul.f32 %v3888_v24, %v3785_v55  ;;  %v1093_v34 = vadd.f32 %v1029_v10, %v705_v21  ;;  %v4658_v63 = vld [vmem:[#allocation107_spill] sm:$0xff]  ;;  %v1032_v3 = vmul.f32 %v3884_v4, %v4659_v45  ;;  %v4664_v10 = vld [vmem:[#allocation50_spill] sm:$0xff] }
 0x240   :  { %v1615_v14 = vpop.permute.xlu1 %1614  ;;  %v1094_v53 = vadd.f32 %v1030_v39, %v706_v20  ;;  %v1031_v38 = vmul.f32 %v3884_v4, %v4658_v63  ;;  %v1868_v18 = vadd.f32 %v1804_v44, %v1480_v57  ;;  %v708_v55 = vmul.f32 %v3891_v58, %v4660_v12 }
 0x241   :  { %v2557_v43 = vpack.c.bf16 %v1864_v46, %v1863_v11  ;;  %v1801_v35 = vmul.f32 %v3897_v51, %v1615_v14  ;;  %v1635_v0 = vpop.permute.xlu0 %1634  ;;  %v707_v46 = vmul.f32 %v3891_v58, %v4661_v2  ;;  %v1481_v56 = vadd.f32 %v1417_v62, %v1093_v34  ;;  %v4668_v34 = vld [vmem:[#allocation52_spill] sm:$0xff] }
 0x242   :  { %v1806_v60 = vmul.f32 %v3897_v51, %v1635_v0  ;;  %v1419_v11 = vmul.f32 %v3888_v24, %v3781_v13  ;;  %v1482_v54 = vadd.f32 %v1418_v40, %v1094_v53  ;;  %v1420_v37 = vmul.f32 %v3888_v24, %v3791_v36  ;;  %v4667_v40 = vld [vmem:[#allocation112_spill] sm:$0xff]  ;;  %v4669_v53 = vld [vmem:[#allocation53_spill] sm:$0xff] }
 0x243   :  { %2700 = vst [vmem:[#allocation2 + $0x58] sm:$0xff] %v2557_v43   ;;  %v1865_v47 = vadd.f32 %v1801_v35, %v1477_v31  ;;  %v1095_v14 = vadd.f32 %v1031_v38, %v707_v46  ;;  %v1033_v19 = vmul.f32 %v3884_v4, %v4662_v17  ;;  %v4663_v43 = vld [vmem:[#allocation110_spill] sm:$0xff]  ;;  %v1096_v0 = vadd.f32 %v1032_v3, %v708_v55  ;;  %v4670_v46 = vld [vmem:[#allocation113_spill] sm:$0xff] }
 0x244   :  { %v1623_v6 = vpop.permute.xlu1 %1622  ;;  %v1034_v35 = vmul.f32 %v3884_v4, %v4663_v43  ;;  %v1870_v30 = vadd.f32 %v1806_v60, %v1482_v54  ;;  %v710_v36 = vmul.f32 %v3891_v58, %v4664_v10  ;;  %v709_v39 = vmul.f32 %v3891_v58, %v4665_v26  ;;  %v4674_v26 = vld [vmem:[#allocation115_spill] sm:$0xff] }
 0x245   :  { %v2562_v29 = vpack.c.bf16 %v1866_v52, %v1865_v47  ;;  %v1803_v27 = vmul.f32 %v3897_v51, %v1623_v6  ;;  %v1643_v41 = vpop.permute.xlu0 %1642  ;;  %v1483_v33 = vadd.f32 %v1419_v11, %v1095_v14  ;;  %v1421_v52 = vmul.f32 %v3888_v24, %v3787_v50  ;;  %v4666_v6 = vld [vmem:[#allocation111_spill] sm:$0xff]  ;;  %v4671_v11 = vld [vmem:[#allocation114_spill] sm:$0xff] }
 0x246   :  { %v1808_v13 = vmul.f32 %v3897_v51, %v1643_v41  ;;  %v1484_v47 = vadd.f32 %v1420_v37, %v1096_v0  ;;  %v1422_v16 = vmul.f32 %v3888_v24, %v3797_v22  ;;  %v1098_v62 = vadd.f32 %v1034_v35, %v710_v36 }
 0x247   :  { %2701 = vst [vmem:[#allocation2 + $0x60] sm:$0xff] %v2562_v29   ;;  %v1867_v42 = vadd.f32 %v1803_v27, %v1479_v48  ;;  %v1097_v48 = vadd.f32 %v1033_v19, %v709_v39  ;;  %v1035_v57 = vmul.f32 %v3884_v4, %v4666_v6  ;;  %v1036_v29 = vmul.f32 %v3884_v4, %v4667_v40 }
 0x248   :  { %v1631_v59 = vpop.permute.xlu1 %1630  ;;  %v1872_v27 = vadd.f32 %v1808_v13, %v1484_v47  ;;  %v712_v22 = vmul.f32 %v3891_v58, %v4668_v34  ;;  %v711_v63 = vmul.f32 %v3891_v58, %v4669_v53  ;;  %v1423_v45 = vmul.f32 %v3888_v24, %v3793_v7 }
 0x249   :  { %v2567_v9 = vpack.c.bf16 %v1868_v18, %v1867_v42  ;;  %v1805_v31 = vmul.f32 %v3897_v51, %v1631_v59  ;;  %v1651_v5 = vpop.permute.xlu0 %1650  ;;  %v1485_v38 = vadd.f32 %v1421_v52, %v1097_v48  ;;  %v1486_v18 = vadd.f32 %v1422_v16, %v1098_v62  ;;  %v4676_v16 = vld [vmem:[#allocation56_spill] sm:$0xff] }
 0x24a   :  { %v1810_v50 = vmul.f32 %v3897_v51, %v1651_v5  ;;  %v1424_v60 = vmul.f32 %v3888_v24, %v3803_v1  ;;  %v1099_v2 = vadd.f32 %v1035_v57, %v711_v63  ;;  %v1038_v59 = vmul.f32 %v3884_v4, %v4671_v11  ;;  %v4673_v5 = vld [vmem:[#allocation55_spill] sm:$0xff] }
 0x24b   :  { %2702 = vst [vmem:[#allocation2 + $0x68] sm:$0xff] %v2567_v9   ;;  %v1869_v28 = vadd.f32 %v1805_v31, %v1481_v56  ;;  %v1037_v56 = vmul.f32 %v3884_v4, %v4670_v46  ;;  %v1100_v54 = vadd.f32 %v1036_v29, %v712_v22  ;;  %v4672_v31 = vld [vmem:[#allocation54_spill] sm:$0xff]  ;;  %v713_v14 = vmul.f32 %v3891_v58, %v4673_v5 }
 0x24c   :  { %v1639_v44 = vpop.permute.xlu1 %1638  ;;  %v1874_v37 = vadd.f32 %v1810_v50, %v1486_v18  ;;  %v714_v1 = vmul.f32 %v3891_v58, %v4672_v31  ;;  %v1487_v17 = vadd.f32 %v1423_v45, %v1099_v2  ;;  %v1425_v19 = vmul.f32 %v3888_v24, %v3799_v15  ;;  %v4679_v22 = vld [vmem:[#allocation118_spill] sm:$0xff]  ;;  %v4681_v18 = vld [vmem:[#allocation59_spill] sm:$0xff]  ;;  %v4683_v31 = vld [vmem:[#allocation120_spill] sm:$0xff] }
 0x24d   :  { %v2572_v20 = vpack.c.bf16 %v1870_v30, %v1869_v28  ;;  %v1807_v25 = vmul.f32 %v3897_v51, %v1639_v44  ;;  %v1659_v21 = vpop.permute.xlu0 %1658  ;;  %v1488_v35 = vadd.f32 %v1424_v60, %v1100_v54  ;;  %v1426_v0 = vmul.f32 %v3888_v24, %v3809_v23 }
 0x24e   :  { %v1812_v7 = vmul.f32 %v3897_v51, %v1659_v21  ;;  %v1101_v10 = vadd.f32 %v1037_v56, %v713_v14  ;;  %v1102_v36 = vadd.f32 %v1038_v59, %v714_v1  ;;  %v1039_v39 = vmul.f32 %v3884_v4, %v4674_v26 }
 0x24f   :  { %2703 = vst [vmem:[#allocation2 + $0x70] sm:$0xff] %v2572_v20   ;;  %v1871_v41 = vadd.f32 %v1807_v25, %v1483_v33  ;;  %v4675_v33 = vld [vmem:[#allocation116_spill] sm:$0xff]  ;;  %v716_v23 = vmul.f32 %v3891_v58, %v4676_v16  ;;  %v4677_v20 = vld [vmem:[#allocation57_spill] sm:$0xff]  ;;  %v1427_v48 = vmul.f32 %v3888_v24, %v3805_v61  ;;  %v1428_v57 = vmul.f32 %v3888_v24, %v3815_v8 }
 0x250   :  { %v1647_v3 = vpop.permute.xlu1 %1646  ;;  %v1040_v52 = vmul.f32 %v3884_v4, %v4675_v33  ;;  %v1876_v44 = vadd.f32 %v1812_v7, %v1488_v35  ;;  %v715_v25 = vmul.f32 %v3891_v58, %v4677_v20  ;;  %v1489_v21 = vadd.f32 %v1425_v19, %v1101_v10  ;;  %v4682_v7 = vld [vmem:[#allocation119_spill] sm:$0xff]  ;;  %v4685_v19 = vld [vmem:[#allocation61_spill] sm:$0xff]  ;;  %v4687_v10 = vld [vmem:[#allocation12_spill] sm:$0xff] }
 0x251   :  { %v2577_v42 = vpack.c.bf16 %v1872_v27, %v1871_v41  ;;  %v1809_v12 = vmul.f32 %v3897_v51, %v1647_v3  ;;  %v1667_v55 = vpop.permute.xlu0 %1666  ;;  %v1490_v6 = vadd.f32 %v1426_v0, %v1102_v36  ;;  %v4678_v41 = vld [vmem:[#allocation117_spill] sm:$0xff]  ;;  %v1042_v53 = vmul.f32 %v3884_v4, %v4679_v22  ;;  %v4680_v3 = vld [vmem:[#allocation58_spill] sm:$0xff]  ;;  %v4686_v0 = vld [vmem:[#allocation8_spill] sm:$0xff] }
 0x252   :  { %v1814_v15 = vmul.f32 %v3897_v51, %v1667_v55  ;;  %v1103_v50 = vadd.f32 %v1039_v39, %v715_v25  ;;  %v1041_v34 = vmul.f32 %v3884_v4, %v4678_v41  ;;  %v1104_v63 = vadd.f32 %v1040_v52, %v716_v23 }
 0x253   :  { %2704 = vst [vmem:[#allocation2 + $0x78] sm:$0xff] %v2577_v42   ;;  %v1873_v9 = vadd.f32 %v1809_v12, %v1485_v38  ;;  %v718_v8 = vmul.f32 %v3891_v58, %v4680_v3  ;;  %v717_v60 = vmul.f32 %v3891_v58, %v4681_v18  ;;  %v1429_v12 = vmul.f32 %v3888_v24, %v3811_v49  ;;  %v4694_v3 = vld [vmem:[#allocation123_spill] sm:$0xff]  ;;  %v4695_v18 = vld [vmem:[#allocation124_spill] sm:$0xff] }
 0x254   :  { %v1655_v43 = vpop.permute.xlu1 %1654  ;;  %v1878_v38 = vadd.f32 %v1814_v15, %v1490_v6  ;;  %v1491_v42 = vadd.f32 %v1427_v48, %v1103_v50  ;;  %v1492_v2 = vadd.f32 %v1428_v57, %v1104_v63  ;;  %v1430_v46 = vmul.f32 %v3888_v24, %v3821_v32  ;;  %v4690_v48 = vld [vmem:[#allocation62_spill] sm:$0xff]  ;;  %v4691_v6 = vld [vmem:[#allocation63_spill] sm:$0xff] }
 0x255   :  { %v2582_v30 = vpack.c.bf16 %v1874_v37, %v1873_v9  ;;  %v1811_v13 = vmul.f32 %v3897_v51, %v1655_v43  ;;  %v1675_v28 = vpop.permute.xlu0 %1674  ;;  %v1105_v54 = vadd.f32 %v1041_v34, %v717_v60  ;;  %v1106_v37 = vadd.f32 %v1042_v53, %v718_v8  ;;  %v4693_v34 = vld [vmem:[#allocation144_spill] sm:$0xff] }
 0x256   :  { %v1816_v61 = vmul.f32 %v3897_v51, %v1675_v28  ;;  %v1043_v9 = vmul.f32 %v3884_v4, %v4682_v7  ;;  %v1044_v1 = vmul.f32 %v3884_v4, %v4683_v31  ;;  %v719_v43 = vmul.f32 %v3891_v58, %v4685_v19  ;;  %v4699_v31 = vld [vmem:[#allocation146_spill] sm:$0xff] }
 0x257   :  { %2705 = vst [vmem:[#allocation2 + $0x80] sm:$0xff] %v2582_v30   ;;  %v1875_v47 = vadd.f32 %v1811_v13, %v1487_v17  ;;  %v4684_v17 = vld [vmem:[#allocation60_spill] sm:$0xff]  ;;  %v1493_v35 = vadd.f32 %v1429_v12, %v1105_v54  ;;  %v1431_v30 = vmul.f32 %v3888_v24, %v4686_v0  ;;  %v1494_v28 = vadd.f32 %v1430_v46, %v1106_v37  ;;  %v4698_v54 = vld [vmem:[#allocation143_spill] sm:$0xff] }
 0x258   :  { %v1663_v62 = vpop.permute.xlu1 %1662  ;;  %v1880_v5 = vadd.f32 %v1816_v61, %v1492_v2  ;;  %v720_v32 = vmul.f32 %v3891_v58, %v4684_v17  ;;  %v1432_v36 = vmul.f32 %v3888_v24, %v4687_v10  ;;  %v1107_v52 = vadd.f32 %v1043_v9, %v719_v43  ;;  %v4696_v2 = vld [vmem:[#allocation64_spill] sm:$0xff]  ;;  %v4701_v43 = vld [vmem:[#allocation126_spill] sm:$0xff] }
 0x259   :  { %v2587_v40 = vpack.c.bf16 %v1876_v44, %v1875_v47  ;;  %v1813_v29 = vmul.f32 %v3897_v51, %v1663_v62  ;;  %v1683_v27 = vpop.permute.xlu0 %1682  ;;  %v4688_v44 = vld [vmem:[#allocation121_spill] sm:$0xff]  ;;  %v4689_v47 = vld [vmem:[#allocation122_spill] sm:$0xff]  ;;  %v722_v62 = vmul.f32 %v3891_v58, %v4690_v48  ;;  %v721_v57 = vmul.f32 %v3891_v58, %v4691_v6  ;;  %v4706_v6 = vld [vmem:[#allocation127_spill] sm:$0xff] }
 0x25a   :  { %v1818_v49 = vmul.f32 %v3897_v51, %v1683_v27  ;;  %v1045_v15 = vmul.f32 %v3884_v4, %v4688_v44  ;;  %v1046_v16 = vmul.f32 %v3884_v4, %v4689_v47  ;;  %v1108_v23 = vadd.f32 %v1044_v1, %v720_v32  ;;  %v4700_v32 = vld [vmem:[#allocation125_spill] sm:$0xff]  ;;  %v4702_v10 = vld [vmem:[#allocation66_spill] sm:$0xff] }
 0x25b   :  { %2706 = vst [vmem:[#allocation2 + $0x88] sm:$0xff] %v2587_v40   ;;  %v1877_v45 = vadd.f32 %v1813_v29, %v1489_v21  ;;  %v1495_v40 = vadd.f32 %v1431_v30, %v1107_v52  ;;  %v4692_v29 = vld [vmem:[#allocation10_spill] sm:$0xff]  ;;  %v1434_v22 = vmul.f32 %v3888_v24, %v4693_v34  ;;  %v1047_v8 = vmul.f32 %v3884_v4, %v4694_v3  ;;  %v4704_v52 = vld [vmem:[#allocation145_spill] sm:$0xff]  ;;  %v4708_v34 = vld [vmem:[#allocation68_spill] sm:$0xff] }
 0x25c   :  { %v1671_v55 = vpop.permute.xlu1 %1670  ;;  %v1882_v20 = vadd.f32 %v1818_v49, %v1494_v28  ;;  %v1433_v27 = vmul.f32 %v3888_v24, %v4692_v29  ;;  %v1496_v41 = vadd.f32 %v1432_v36, %v1108_v23  ;;  %v1109_v61 = vadd.f32 %v1045_v15, %v721_v57 }
 0x25d   :  { %v2592_v56 = vpack.c.bf16 %v1878_v38, %v1877_v45  ;;  %v1815_v11 = vmul.f32 %v3897_v51, %v1671_v55  ;;  %v1691_v59 = vpop.permute.xlu0 %1690  ;;  %v1110_v45 = vadd.f32 %v1046_v16, %v722_v62  ;;  %v1048_v60 = vmul.f32 %v3884_v4, %v4695_v18  ;;  %v4705_v16 = vld [vmem:[#allocation148_spill] sm:$0xff]  ;;  %v4711_v18 = vld [vmem:[#allocation150_spill] sm:$0xff] }
 0x25e   :  { %v1820_v25 = vmul.f32 %v3897_v51, %v1691_v59  ;;  %v724_v46 = vmul.f32 %v3891_v58, %v4696_v2  ;;  %v1497_v59 = vadd.f32 %v1433_v27, %v1109_v61  ;;  %v1435_v37 = vmul.f32 %v3888_v24, %v4698_v54  ;;  %v4710_v61 = vld [vmem:[#allocation147_spill] sm:$0xff] }
 0x25f   :  { %2707 = vst [vmem:[#allocation2 + $0x90] sm:$0xff] %v2592_v56   ;;  %v1879_v14 = vadd.f32 %v1815_v11, %v1491_v42  ;;  %v4697_v56 = vld [vmem:[#allocation65_spill] sm:$0xff]  ;;  %v1498_v9 = vadd.f32 %v1434_v22, %v1110_v45  ;;  %v1436_v1 = vmul.f32 %v3888_v24, %v4699_v31  ;;  %v1049_v19 = vmul.f32 %v3884_v4, %v4700_v32  ;;  %v4714_v31 = vld [vmem:[#allocation70_spill] sm:$0xff] }
 0x260   :  { %v1679_v13 = vpop.permute.xlu1 %1678  ;;  %v1884_v42 = vadd.f32 %v1820_v25, %v1496_v41  ;;  %v723_v11 = vmul.f32 %v3891_v58, %v4697_v56  ;;  %v1112_v0 = vadd.f32 %v1048_v60, %v724_v46  ;;  %v726_v36 = vmul.f32 %v3891_v58, %v4702_v10  ;;  %v4712_v46 = vld [vmem:[#allocation129_spill] sm:$0xff] }
 0x261   :  { %v2597_v26 = vpack.c.bf16 %v1880_v5, %v1879_v14  ;;  %v1817_v39 = vmul.f32 %v3897_v51, %v1679_v13  ;;  %v1699_v33 = vpop.permute.xlu0 %1698  ;;  %v1437_v44 = vmul.f32 %v3888_v24, %v4704_v52  ;;  %v1438_v23 = vmul.f32 %v3888_v24, %v4705_v16  ;;  %v4720_v16 = vld [vmem:[#allocation72_spill] sm:$0xff] }
 0x262   :  { %v1822_v12 = vmul.f32 %v3897_v51, %v1699_v33  ;;  %v1111_v17 = vadd.f32 %v1047_v8, %v723_v11  ;;  %v1500_v47 = vadd.f32 %v1436_v1, %v1112_v0  ;;  %v1051_v57 = vmul.f32 %v3884_v4, %v4706_v6  ;;  %v4713_v11 = vld [vmem:[#allocation130_spill] sm:$0xff] }
 0x263   :  { %2708 = vst [vmem:[#allocation2 + $0x98] sm:$0xff] %v2597_v26   ;;  %v1881_v21 = vadd.f32 %v1817_v39, %v1493_v35  ;;  %v1050_v35 = vmul.f32 %v3884_v4, %v4701_v43  ;;  %v4703_v26 = vld [vmem:[#allocation67_spill] sm:$0xff]  ;;  %v728_v22 = vmul.f32 %v3891_v58, %v4708_v34  ;;  %v1439_v45 = vmul.f32 %v3888_v24, %v4710_v61 }
 0x264   :  { %v1687_v50 = vpop.permute.xlu1 %1686  ;;  %v1886_v30 = vadd.f32 %v1822_v12, %v1498_v9  ;;  %v725_v39 = vmul.f32 %v3891_v58, %v4703_v26  ;;  %v1499_v33 = vadd.f32 %v1435_v37, %v1111_v17  ;;  %v1440_v60 = vmul.f32 %v3888_v24, %v4711_v18  ;;  %v4716_v17 = vld [vmem:[#allocation149_spill] sm:$0xff]  ;;  %v4718_v26 = vld [vmem:[#allocation131_spill] sm:$0xff]  ;;  %v4726_v18 = vld [vmem:[#allocation74_spill] sm:$0xff] }
 0x265   :  { %v2602_v53 = vpack.c.bf16 %v1882_v20, %v1881_v21  ;;  %v1819_v63 = vmul.f32 %v3897_v51, %v1687_v50  ;;  %v1707_v38 = vpop.permute.xlu0 %1706  ;;  %v1114_v62 = vadd.f32 %v1050_v35, %v726_v36  ;;  %v1053_v56 = vmul.f32 %v3884_v4, %v4712_v46  ;;  %v4717_v35 = vld [vmem:[#allocation152_spill] sm:$0xff] }
 0x266   :  { %v1824_v13 = vmul.f32 %v3897_v51, %v1707_v38  ;;  %v1113_v48 = vadd.f32 %v1049_v19, %v725_v39  ;;  %v730_v1 = vmul.f32 %v3891_v58, %v4714_v31  ;;  %v1441_v32 = vmul.f32 %v3888_v24, %v4716_v17 }
 0x267   :  { %2709 = vst [vmem:[#allocation2 + $0xa0] sm:$0xff] %v2602_v53   ;;  %v1883_v55 = vadd.f32 %v1819_v63, %v1495_v40  ;;  %v4707_v40 = vld [vmem:[#allocation128_spill] sm:$0xff]  ;;  %v4709_v53 = vld [vmem:[#allocation69_spill] sm:$0xff]  ;;  %v1502_v8 = vadd.f32 %v1438_v23, %v1114_v62  ;;  %v1442_v0 = vmul.f32 %v3888_v24, %v4717_v35  ;;  %v1055_v39 = vmul.f32 %v3884_v4, %v4718_v26 }
 0x268   :  { %v1695_v7 = vpop.permute.xlu1 %1694  ;;  %v1052_v29 = vmul.f32 %v3884_v4, %v4707_v40  ;;  %v1888_v27 = vadd.f32 %v1824_v13, %v1500_v47  ;;  %v727_v63 = vmul.f32 %v3891_v58, %v4709_v53  ;;  %v1501_v38 = vadd.f32 %v1437_v44, %v1113_v48  ;;  %v4722_v48 = vld [vmem:[#allocation151_spill] sm:$0xff]  ;;  %v4723_v40 = vld [vmem:[#allocation154_spill] sm:$0xff]  ;;  %v4732_v35 = vld [vmem:[#allocation76_spill] sm:$0xff] }
 0x269   :  { %v2607_v5 = vpack.c.bf16 %v1884_v42, %v1883_v55  ;;  %v1821_v49 = vmul.f32 %v3897_v51, %v1695_v7  ;;  %v1715_v14 = vpop.permute.xlu0 %1714  ;;  %v732_v23 = vmul.f32 %v3891_v58, %v4720_v16  ;;  %v1443_v62 = vmul.f32 %v3888_v24, %v4722_v48  ;;  %v4736_v16 = vld [vmem:[#allocation137_spill] sm:$0xff] }
 0x26a   :  { %v1826_v50 = vmul.f32 %v3897_v51, %v1715_v14  ;;  %v1115_v2 = vadd.f32 %v1051_v57, %v727_v63  ;;  %v1116_v54 = vadd.f32 %v1052_v29, %v728_v22  ;;  %v1444_v29 = vmul.f32 %v3888_v24, %v4723_v40  ;;  %v4724_v22 = vld [vmem:[#allocation133_spill] sm:$0xff]  ;;  %v4725_v63 = vld [vmem:[#allocation134_spill] sm:$0xff] }
 0x26b   :  { %2710 = vst [vmem:[#allocation2 + $0xa8] sm:$0xff] %v2607_v5   ;;  %v1885_v28 = vadd.f32 %v1821_v49, %v1497_v59  ;;  %v1054_v59 = vmul.f32 %v3884_v4, %v4713_v11  ;;  %v4715_v5 = vld [vmem:[#allocation71_spill] sm:$0xff]  ;;  %v1057_v53 = vmul.f32 %v3884_v4, %v4724_v22  ;;  %v4738_v40 = vld [vmem:[#allocation78_spill] sm:$0xff] }
 0x26c   :  { %v1703_v15 = vpop.permute.xlu1 %1702  ;;  %v1890_v37 = vadd.f32 %v1826_v50, %v1502_v8  ;;  %v729_v49 = vmul.f32 %v3891_v58, %v4715_v5  ;;  %v1503_v14 = vadd.f32 %v1439_v45, %v1115_v2  ;;  %v1504_v43 = vadd.f32 %v1440_v60, %v1116_v54  ;;  %v4728_v2 = vld [vmem:[#allocation153_spill] sm:$0xff]  ;;  %v4730_v5 = vld [vmem:[#allocation135_spill] sm:$0xff] }
 0x26d   :  { %v2612_v20 = vpack.c.bf16 %v1886_v30, %v1885_v28  ;;  %v1823_v25 = vmul.f32 %v3897_v51, %v1703_v15  ;;  %v1723_v21 = vpop.permute.xlu0 %1722  ;;  %v1118_v36 = vadd.f32 %v1054_v59, %v730_v1  ;;  %v734_v60 = vmul.f32 %v3891_v58, %v4726_v18  ;;  %v4729_v59 = vld [vmem:[#allocation156_spill] sm:$0xff] }
 0x26e   :  { %v1828_v7 = vmul.f32 %v3897_v51, %v1723_v21  ;;  %v1117_v10 = vadd.f32 %v1053_v56, %v729_v49  ;;  %v1445_v46 = vmul.f32 %v3888_v24, %v4728_v2  ;;  %v1446_v54 = vmul.f32 %v3888_v24, %v4729_v59 }
 0x26f   :  { %2711 = vst [vmem:[#allocation2 + $0xb0] sm:$0xff] %v2612_v20   ;;  %v1887_v41 = vadd.f32 %v1823_v25, %v1499_v33  ;;  %v4719_v33 = vld [vmem:[#allocation132_spill] sm:$0xff]  ;;  %v4721_v20 = vld [vmem:[#allocation73_spill] sm:$0xff]  ;;  %v1506_v57 = vadd.f32 %v1442_v0, %v1118_v36  ;;  %v1059_v49 = vmul.f32 %v3884_v4, %v4730_v5  ;;  %v736_v0 = vmul.f32 %v3891_v58, %v4732_v35 }
 0x270   :  { %v1711_v3 = vpop.permute.xlu1 %1710  ;;  %v1056_v52 = vmul.f32 %v3884_v4, %v4719_v33  ;;  %v1892_v44 = vadd.f32 %v1828_v7, %v1504_v43  ;;  %v731_v25 = vmul.f32 %v3891_v58, %v4721_v20  ;;  %v1505_v21 = vadd.f32 %v1441_v32, %v1117_v10  ;;  %v4734_v10 = vld [vmem:[#allocation155_spill] sm:$0xff]  ;;  %v4735_v33 = vld [vmem:[#allocation20_spill] sm:$0xff]  ;;  %v4737_v20 = vld [vmem:[#allocation138_spill] sm:$0xff] }
 0x271   :  { %v2617_v42 = vpack.c.bf16 %v1888_v27, %v1887_v41  ;;  %v1825_v12 = vmul.f32 %v3897_v51, %v1711_v3  ;;  %v1731_v55 = vpop.permute.xlu0 %1730  ;;  %v1447_v36 = vmul.f32 %v3888_v24, %v4734_v10 }
 0x272   :  { %v1830_v15 = vmul.f32 %v3897_v51, %v1731_v55  ;;  %v1119_v34 = vadd.f32 %v1055_v39, %v731_v25  ;;  %v1120_v61 = vadd.f32 %v1056_v52, %v732_v23  ;;  %v1448_v52 = vmul.f32 %v3888_v24, %v4735_v33 }
 0x273   :  { %2712 = vst [vmem:[#allocation2 + $0xb8] sm:$0xff] %v2617_v42   ;;  %v1889_v9 = vadd.f32 %v1825_v12, %v1501_v38  ;;  %v1058_v38 = vmul.f32 %v3884_v4, %v4725_v63  ;;  %v4727_v42 = vld [vmem:[#allocation75_spill] sm:$0xff]  ;;  %v1061_v23 = vmul.f32 %v3884_v4, %v4736_v16  ;;  %v1062_v25 = vmul.f32 %v3884_v4, %v4737_v20 }
 0x274   :  { %v1719_v19 = vpop.permute.xlu1 %1718  ;;  %v1894_v45 = vadd.f32 %v1830_v15, %v1506_v57  ;;  %v733_v12 = vmul.f32 %v3891_v58, %v4727_v42  ;;  %v1507_v55 = vadd.f32 %v1443_v62, %v1119_v34  ;;  %v1508_v11 = vadd.f32 %v1444_v29, %v1120_v61  ;;  %v4740_v34 = vld [vmem:[#allocation157_spill] sm:$0xff] }
 0x275   :  { %v2622_v30 = vpack.c.bf16 %v1890_v37, %v1889_v9  ;;  %v1827_v13 = vmul.f32 %v3897_v51, %v1719_v19  ;;  %v1739_v28 = vpop.permute.xlu0 %1738  ;;  %v1122_v1 = vadd.f32 %v1058_v38, %v734_v60  ;;  %v738_v29 = vmul.f32 %v3891_v58, %v4738_v40  ;;  %v4741_v38 = vld [vmem:[#allocation159_spill] sm:$0xff]  ;;  %v4742_v60 = vld [vmem:[#allocation21_spill] sm:$0xff] }
 0x276   :  { %v1832_v3 = vmul.f32 %v3897_v51, %v1739_v28  ;;  %v1121_v31 = vadd.f32 %v1057_v53, %v733_v12  ;;  %v1449_v22 = vmul.f32 %v3888_v24, %v4740_v34  ;;  %v1450_v61 = vmul.f32 %v3888_v24, %v4741_v38  ;;  %v4743_v12 = vld [vmem:[#allocation139_spill] sm:$0xff] }
 0x277   :  { %2713 = vst [vmem:[#allocation2 + $0xc0] sm:$0xff] %v2622_v30   ;;  %v1891_v47 = vadd.f32 %v1827_v13, %v1503_v14  ;;  %v4731_v14 = vld [vmem:[#allocation136_spill] sm:$0xff]  ;;  %v4733_v30 = vld [vmem:[#allocation77_spill] sm:$0xff]  ;;  %v1510_v39 = vadd.f32 %v1446_v54, %v1122_v1  ;;  %v1126_v18 = vadd.f32 %v1062_v25, %v738_v29  ;;  %v1063_v42 = vmul.f32 %v3884_v4, %v4742_v60 }
 0x278   :  { %v1727_v6 = vpop.permute.xlu1 %1726  ;;  %v1060_v17 = vmul.f32 %v3884_v4, %v4731_v14  ;;  %v1896_v32 = vadd.f32 %v1832_v3, %v1508_v11  ;;  %v735_v13 = vmul.f32 %v3891_v58, %v4733_v30  ;;  %v1509_v28 = vadd.f32 %v1445_v46, %v1121_v31  ;;  %v4744_v11 = vld [vmem:[#allocation80_spill] sm:$0xff]  ;;  %v4745_v54 = vld [vmem:[#allocation81_spill] sm:$0xff]  ;;  %v4747_v14 = vld [vmem:[#allocation22_spill] sm:$0xff] }
 0x279   :  { %v2627_v27 = vpack.c.bf16 %v1892_v44, %v1891_v47  ;;  %v1829_v50 = vmul.f32 %v3897_v51, %v1727_v6  ;;  %v1747_v41 = vpop.permute.xlu0 %1746  ;;  %v740_v59 = vmul.f32 %v3891_v58, %v4744_v11 }
 0x27a   :  { %v1834_v19 = vmul.f32 %v3897_v51, %v1747_v41  ;;  %v1123_v47 = vadd.f32 %v1059_v49, %v735_v13  ;;  %v1124_v48 = vadd.f32 %v1060_v17, %v736_v0  ;;  %v1514_v49 = vadd.f32 %v1450_v61, %v1126_v18 }
 0x27b   :  { %2714 = vst [vmem:[#allocation2 + $0xc8] sm:$0xff] %v2627_v27   ;;  %v1893_v8 = vadd.f32 %v1829_v50, %v1505_v21  ;;  %v4739_v27 = vld [vmem:[#allocation79_spill] sm:$0xff] }
 0x27c   :  { %v1735_v56 = vpop.permute.xlu1 %1734  ;;  %v1898_v62 = vadd.f32 %v1834_v19, %v1510_v39  ;;  %v737_v50 = vmul.f32 %v3891_v58, %v4739_v27  ;;  %v1511_v41 = vadd.f32 %v1447_v36, %v1123_v47  ;;  %v1512_v63 = vadd.f32 %v1448_v52, %v1124_v48 }
 0x27d   :  { %v2632_v37 = vpack.c.bf16 %v1894_v45, %v1893_v8  ;;  %v1831_v7 = vmul.f32 %v3897_v51, %v1735_v56  ;;  %v1755_v9 = vpop.permute.xlu0 %1754 }
 0x27e   :  { %v1836_v6 = vmul.f32 %v3897_v51, %v1755_v9  ;;  %v1125_v8 = vadd.f32 %v1061_v23, %v737_v50  ;;  %v4746_v9 = vld [vmem:[#allocation158_spill] sm:$0xff] }
 0x27f   :  { %2715 = vst [vmem:[#allocation2 + $0xd0] sm:$0xff] %v2632_v37   ;;  %v1895_v43 = vadd.f32 %v1831_v7, %v1507_v55  ;;  %v1064_v55 = vmul.f32 %v3884_v4, %v4743_v12  ;;  %v739_v37 = vmul.f32 %v3891_v58, %v4745_v54  ;;  %v1451_v31 = vmul.f32 %v3888_v24, %v4746_v9 }
 0x280   :  { %v1743_v26 = vpop.permute.xlu1 %1742  ;;  %v1900_v2 = vadd.f32 %v1836_v6, %v1512_v63  ;;  %v1513_v7 = vadd.f32 %v1449_v22, %v1125_v8  ;;  %v1452_v4 = vmul.f32 %v3888_v24, %v4747_v14 }
 0x281   :  { %v2637_v44 = vpack.c.bf16 %v1896_v32, %v1895_v43  ;;  %v1833_v15 = vmul.f32 %v3897_v51, %v1743_v26  ;;  %v1763_v21 = vpop.permute.xlu0 %1762  ;;  %v1127_v19 = vadd.f32 %v1063_v42, %v739_v37  ;;  %v1128_v43 = vadd.f32 %v1064_v55, %v740_v59 }
 0x282   :  { %v1838_v46 = vmul.f32 %v3897_v51, %v1763_v21 }
 0x283   :  { %2716 = vst [vmem:[#allocation2 + $0xd8] sm:$0xff] %v2637_v44   ;;  %v1897_v57 = vadd.f32 %v1833_v15, %v1509_v28  ;;  %v1515_v13 = vadd.f32 %v1451_v31, %v1127_v19  ;;  %v1516_v28 = vadd.f32 %v1452_v4, %v1128_v43 }
 0x284   :  { %v1751_v53 = vpop.permute.xlu1 %1750  ;;  %v1902_v35 = vadd.f32 %v1838_v46, %v1514_v49 }
 0x285   :  { %v2642_v45 = vpack.c.bf16 %v1898_v62, %v1897_v57  ;;  %v1835_v3 = vmul.f32 %v3897_v51, %v1751_v53  ;;  %v1771_v1 = vpop.permute.xlu0 %1770 }
 0x286   :  { %v1840_v0 = vmul.f32 %v3897_v51, %v1771_v1 }
 0x287   :  { %2717 = vst [vmem:[#allocation2 + $0xe0] sm:$0xff] %v2642_v45   ;;  %v1899_v56 = vadd.f32 %v1835_v3, %v1511_v41 }
 0x288   :  { %v1759_v5 = vpop.permute.xlu1 %1758  ;;  %v1904_v26 = vadd.f32 %v1840_v0, %v1516_v28 }
 0x289   :  { %v2647_v17 = vpack.c.bf16 %v1900_v2, %v1899_v56  ;;  %v1837_v32 = vmul.f32 %v3897_v51, %v1759_v5 }
 0x28b   :  { %2718 = vst [vmem:[#allocation2 + $0xe8] sm:$0xff] %v2647_v17   ;;  %v1901_v58 = vadd.f32 %v1837_v32, %v1513_v7 }
 0x28c   :  { %v1767_v30 = vpop.permute.xlu1 %1766 }
 0x28d   :  { %v2652_v10 = vpack.c.bf16 %v1902_v35, %v1901_v58  ;;  %v1839_v36 = vmul.f32 %v3897_v51, %v1767_v30 }
 0x28f   :  { %2719 = vst [vmem:[#allocation2 + $0xf0] sm:$0xff] %v2652_v10   ;;  %v1903_v24 = vadd.f32 %v1839_v36, %v1515_v13 }
 0x291   :  { %v2657_v39 = vpack.c.bf16 %v1904_v26, %v1903_v24 }
 0x293   :  { %2720 = vst [vmem:[#allocation2 + $0xf8] sm:$0xff] %v2657_v39  }
 0x294   :  { %2747 = shalt.err (!%p2744_p4)
}
 0x295   :  { %s2748_s30 = scalar_lea.hbm %s4362_s4, 4096 }
 0x296   :  { %p2749_p5 = scmp.ne.s32.totalorder %s4362_s4, %s2748_s30  ;;  %p2752_p6 = scmp.lt.u32.totalorder %s2748_s30, %s4362_s4 }
 0x298   :  { %p2754_p7 = pnand %p2752_p6, %p2749_p5 }
 0x29a   :  { %2757 = shalt.err (!%p2754_p7)
}
 0x29b   :  { %s2765_s9 = smov 64   ;;  %s2766_s10 = smov 4  }
 0x29c   :  { %2236 = dma.vmem_to_hbm [thread:$0]  %s2231_s26, 4096, %s4362_s4, [#allocation3], %s2765_s9, %s2765_s9, %s2766_s10  }
 0x29d   :  { %2758 = dma.done.wait [#allocation3], 4096  }
 0x29e   :  { %2759 = vsyncadd [#allocation3], 4294963200 }
 0x29f   :  { %2240 = vsyncpa [#allocation3], 1 }

</bundles_post_ra>
